<compile_context>
chip_gen: v7x
topology: tpu7x:2x2x1
jax: 0.10.0
libtpu: 0.0.40
codegen_flags: <defaults>
</compile_context>

<pallas_src>
import functools

import jax
import jax.numpy as jnp
from jax.experimental import pallas as pl
from jax.experimental.pallas import tpu as pltpu


VAL_HIDDEN = 64  # width of val_fc1 in the PyTorch module


# ----------------------------------------------------------------------------
# Fused forward kernel (factory closes over static geometry)
# ----------------------------------------------------------------------------

def _make_kernel(H, W, A, pad_a):
    P = H * W

    def kernel(x_ref, mask_ref,
               w1_ref, b1_ref, w2_ref, b2_ref, w3_ref, b3_ref,
               w4_ref, b4_ref, wh_ref, bh_ref, wv2_ref, bv2_ref,
               out_ref, flat_ref):
        """One batch tile of the whole DeeperNet forward.

        Activations are (C, Rt) with Rt = boards*H*W lanes (multiple of 128).
        3x3 convs = 9 lane rotations + border masks + 9 accumulated dots.
        All inter-layer activations live in vector registers (no scratch).
        """
        Rt = x_ref.shape[-1]
        Bt = flat_ref.shape[0]
        Cs = w4_ref.shape[0]

        def conv3x3_relu(act, w_ref, b_ref, cast_bf16):
            cout = w_ref.shape[1]
            acc = jnp.zeros((cout, Rt), jnp.float32)
            for t in range(9):                       # static unroll, 9 taps
                dh, dw = t // 3 - 1, t % 3 - 1
                off = dh * W + dw
                # tap[ci, r] = act[ci, r + off] for in-image taps, else 0.
                tap = act if off == 0 else pltpu.roll(act, (-off) % Rt, axis=1)
                tap = tap * mask_ref[t:t + 1, :]     # zero out-of-image taps
                if cast_bf16:
                    tap = tap.astype(jnp.bfloat16)
                acc = acc + jnp.dot(w_ref[t], tap,
                                    preferred_element_type=jnp.float32)
            return jnp.maximum(acc + b_ref[...], 0.0)          # (cout, Rt) f32

        x = x_ref[...]                                         # (Cin, Rt) f32
        y1 = conv3x3_relu(x,  w1_ref, b1_ref, cast_bf16=False)  # (16, Rt) f32
        y2 = conv3x3_relu(y1, w2_ref, b2_ref, cast_bf16=False)  # (64, Rt) f32
        y3 = conv3x3_relu(y2, w3_ref, b3_ref, cast_bf16=True)   # (64, Rt) f32

        # conv4 (1x1) in the same layout -- no transpose needed.
        y4 = jnp.dot(w4_ref[...], y3.astype(jnp.bfloat16),
                     preferred_element_type=jnp.float32)
        y4 = jnp.maximum(y4 + b4_ref[...], 0.0)                  # (Cs, Rt) f32

        # Bridge to the FC heads (PyTorch NCHW flatten: flat[b, c*P + p]).
        # This is the single unavoidable lanes->sublanes move (Bt*Cs small
        # stores); everything else in the kernel is lane/sublane aligned.
        for b in range(Bt):
            for c in range(Cs):
                flat_ref[b:b + 1, c * P:(c + 1) * P] = \
                    y4[c:c + 1, b * P:(b + 1) * P]

        # Fused heads: columns = [policy padded to pad_a lanes | val_fc1(64)].
        xh = jnp.dot(flat_ref[...].astype(jnp.bfloat16), wh_ref[...],
                     preferred_element_type=jnp.float32) + bh_ref[...]

        # Softmax over pad_a lanes; padded lanes carry bias -1e30 -> exp == 0.
        logits = xh[:, :pad_a]
        e = jnp.exp(logits - jnp.max(logits, axis=-1, keepdims=True))
        probs = e / jnp.sum(e, axis=-1, keepdims=True)   # exact divide: rows sum to 1

        hv = jnp.maximum(xh[:, pad_a:], 0.0)                       # (Bt, 64)
        val = jnp.sum(hv * wv2_ref[...], axis=-1, keepdims=True) + bv2_ref[...]

        # One lane-dense store: probs in lanes [0, A), value at lane A.
        lane = jax.lax.broadcasted_iota(jnp.int32, (1, pad_a), 1)
        out_ref[...] = probs + val * (lane == A).astype(jnp.float32)

    return kernel


# ----------------------------------------------------------------------------
# pallas_call wrapper (batch grid, weights resident)
# ----------------------------------------------------------------------------

def _deeper_net_pallas(x_cr, masks, pp, *, H, W, action_num, batch_tile=None):
    Cin, R = x_cr.shape
    P = H * W
    B = R // P
    if batch_tile is None:
        batch_tile = B                      # demo: whole batch in one step
    assert B % batch_tile == 0
    Rt = batch_tile * P
    assert Rt % 128 == 0, "lane tile must be a multiple of 128"
    num_tiles = B // batch_tile
    assert num_tiles == 1 or batch_tile % 8 == 0   # (8,128) rule on out block

    Cs = pp["w4"].shape[0]
    F = Cs * P
    pad_a = pp["wh"].shape[1] - VAL_HIDDEN

    kernel = _make_kernel(H, W, action_num, pad_a)

    def full(arr):                           # whole array resident every step
        nd = arr.ndim
        return pl.BlockSpec(arr.shape, lambda i, _nd=nd: (0,) * _nd)

    grid_spec = pltpu.PrefetchScalarGridSpec(
        num_scalar_prefetch=0,
        grid=(num_tiles,),
        in_specs=[
            pl.BlockSpec((Cin, Rt), lambda i: (0, i)),   # input tile (lanes)
            full(masks),
            full(pp["w1"]), full(pp["b1"]),
            full(pp["w2"]), full(pp["b2"]),
            full(pp["w3"]), full(pp["b3"]),
            full(pp["w4"]), full(pp["b4"]),
            full(pp["wh"]), full(pp["bh"]),
            full(pp["wv2"]), full(pp["bv2"]),
        ],
        out_specs=pl.BlockSpec((batch_tile, pad_a), lambda i: (i, 0)),
        scratch_shapes=[pltpu.VMEM((batch_tile, F), jnp.float32)],
    )

    return pl.pallas_call(
        kernel,
        out_shape=jax.ShapeDtypeStruct((B, pad_a), jnp.float32),
        grid_spec=grid_spec,
        compiler_params=pltpu.CompilerParams(
            dimension_semantics=("parallel",),
            vmem_limit_bytes=32 * 1024 * 1024),
    )(x_cr, masks, pp["w1"], pp["b1"], pp["w2"], pp["b2"], pp["w3"], pp["b3"],
      pp["w4"], pp["b4"], pp["wh"], pp["bh"], pp["wv2"], pp["bv2"])


# ----------------------------------------------------------------------------
# Parameters: PyTorch-style init + one-time kernel-layout prep
# ----------------------------------------------------------------------------

def init_params(key, state_num, pos_num, action_num):
    """PyTorch-default-style (uniform +/- 1/sqrt(fan_in)) init, OIHW weights."""
    def uni(k, shape, fan_in):
        bound = 1.0 / jnp.sqrt(jnp.float32(fan_in))
        return jax.random.uniform(k, shape, jnp.float32, -bound, bound)

    ks = jax.random.split(key, 14)
    p = {}
    p["conv1_w"] = uni(ks[0], (16, state_num, 3, 3), state_num * 9)
    p["conv1_b"] = uni(ks[1], (16,), state_num * 9)
    p["conv2_w"] = uni(ks[2], (64, 16, 3, 3), 16 * 9)
    p["conv2_b"] = uni(ks[3], (64,), 16 * 9)
    p["conv3_w"] = uni(ks[4], (64, 64, 3, 3), 64 * 9)
    p["conv3_b"] = uni(ks[5], (64,), 64 * 9)
    p["conv4_w"] = uni(ks[6], (state_num, 64, 1, 1), 64)
    p["conv4_b"] = uni(ks[7], (state_num,), 64)
    f = state_num * pos_num
    p["act_fc1_w"] = uni(ks[8], (action_num, f), f)
    p["act_fc1_b"] = uni(ks[9], (action_num,), f)
    p["val_fc1_w"] = uni(ks[10], (64, f), f)
    p["val_fc1_b"] = uni(ks[11], (64,), f)
    p["val_fc2_w"] = uni(ks[12], (1, 64), 64)
    p["val_fc2_b"] = uni(ks[13], (1,), 64)
    return p


def prepare_params(p, action_num):
    """One-time host-side re-layout for the kernel:
       * 3x3 conv weights as 9 taps (9, Cout, Cin); conv1/conv2 stay f32
         (tight numerics), conv3/conv4/head weights bf16.
       * fused head weight: [policy (padded to 128 lanes) | val_fc1(64)],
         padded policy lanes get a -1e30 bias so softmax ignores them."""
    bf, f32 = jnp.bfloat16, jnp.float32
    Cs = p["conv4_w"].shape[0]
    F = p["act_fc1_w"].shape[1]
    A = action_num
    pad_a = ((A + 1 + 127) // 128) * 128     # policy lanes incl. spare for value

    def taps(w, dtype):                       # (Cout, Cin, 3, 3) -> (9, Cout, Cin)
        co, ci = w.shape[0], w.shape[1]
        return jnp.transpose(w, (2, 3, 0, 1)).reshape(9, co, ci).astype(dtype)

    wh = jnp.concatenate(
        [p["act_fc1_w"].T, jnp.zeros((F, pad_a - A), f32), p["val_fc1_w"].T],
        axis=1).astype(bf)
    bh = jnp.concatenate(
        [p["act_fc1_b"], jnp.full((pad_a - A,), -1e30, f32), p["val_fc1_b"]]
    ).reshape(1, -1).astype(f32)

    return {
        "w1": taps(p["conv1_w"], f32), "b1": p["conv1_b"].reshape(-1, 1).astype(f32),
        "w2": taps(p["conv2_w"], f32), "b2": p["conv2_b"].reshape(-1, 1).astype(f32),
        "w3": taps(p["conv3_w"], bf),  "b3": p["conv3_b"].reshape(-1, 1).astype(f32),
        "w4": p["conv4_w"].reshape(Cs, -1).astype(bf),
        "b4": p["conv4_b"].reshape(-1, 1).astype(f32),
        "wh": wh, "bh": bh,
        "wv2": p["val_fc2_w"].reshape(1, VAL_HIDDEN).astype(f32),
        "bv2": p["val_fc2_b"].reshape(1, 1).astype(f32),
    }


def _tap_masks(H, W, boards):
    """(9, boards*H*W) f32 validity masks for the 9 conv taps (handles the
    zero padding and the lane-roll wraparound in one go)."""
    p = jnp.arange(H * W)
    h, w = p // W, p % W
    rows = []
    for dh in (-1, 0, 1):
        for dw in (-1, 0, 1):
            rows.append((h + dh >= 0) & (h + dh < H) & (w + dw >= 0) & (w + dw < W))
    m = jnp.stack(rows).astype(jnp.float32)          # (9, P)
    return jnp.tile(m, (1, boards))                  # (9, boards*P)


@functools.partial(jax.jit, static_argnums=(2,))
def deeper_net_forward(state_input_nchw, prepped, action_num):
    """NCHW input (PyTorch layout) -> (softmax policy (B, A), value (B, 1))."""
    x = state_input_nchw.astype(jnp.float32)
    B, Cin, H, W = x.shape
    # Kernel-friendly layout: channels on sublanes, batch*H*W positions on
    # lanes.  Tiny here; for serving batch sizes accept this layout upstream
    # instead of transposing per call.
    x_cr = jnp.transpose(x, (1, 0, 2, 3)).reshape(Cin, B * H * W)
    masks = _tap_masks(H, W, B)
    out = _deeper_net_pallas(x_cr, masks, prepped, H=H, W=W,
                             action_num=action_num)
    act = out[:, :action_num]
    val = out[:, action_num:action_num + 1]
    return act, val


# ----------------------------------------------------------------------------
# Pure-JAX f32 reference (for correctness checking only)
# ----------------------------------------------------------------------------

def _reference_forward(x_nchw, p):
    def conv(x, w, b, pad):
        y = jax.lax.conv_general_dilated(
            x, w, window_strides=(1, 1), padding=[(pad, pad), (pad, pad)],
            dimension_numbers=("NCHW", "OIHW", "NCHW"))
        return jax.nn.relu(y + b.reshape(1, -1, 1, 1))

    x = conv(x_nchw, p["conv1_w"], p["conv1_b"], 1)
    x = conv(x, p["conv2_w"], p["conv2_b"], 1)
    x = conv(x, p["conv3_w"], p["conv3_b"], 1)
    x = conv(x, p["conv4_w"], p["conv4_b"], 0)
    xf = x.reshape(x.shape[0], -1)                               # NCHW flatten
    act = jax.nn.softmax(xf @ p["act_fc1_w"].T + p["act_fc1_b"], axis=-1)
    h = jax.nn.relu(xf @ p["val_fc1_w"].T + p["val_fc1_b"])
    val = h @ p["val_fc2_w"].T + p["val_fc2_b"]
    return act, val


# ----------------------------------------------------------------------------
# Demo / self-test
# ----------------------------------------------------------------------------

if __name__ == "__main__":
    xDim, yDim = 8, 8
    StateNum = 4
    posNum = xDim * yDim          # 64
    actionNum = 16
    batch = 2

    key = jax.random.PRNGKey(0)
    k_in, k_par = jax.random.split(key)

    state_input = jax.random.normal(
        k_in, (batch, StateNum, xDim, yDim), jnp.float32)   # NCHW, like PyTorch
    params = init_params(k_par, StateNum, posNum, actionNum)
    prepped = prepare_params(params, actionNum)              # one-time prep

    x_act, x_val = deeper_net_forward(state_input, prepped, actionNum)
    jax.block_until_ready((x_act, x_val))

    assert x_act.shape == (batch, actionNum)
    assert x_val.shape == (batch, 1)
    # softmax rows sum to 1 (exact divide kept in the kernel for this property)
    assert jnp.allclose(jnp.sum(x_act, axis=-1), 1.0, atol=1e-5)

    # Compare against f32 reference (conv3/conv4/head use bf16 MXU operands).
    ref_act, ref_val = _reference_forward(state_input, params)
    assert jnp.allclose(x_act, ref_act, atol=2e-2), \
        float(jnp.max(jnp.abs(x_act - ref_act)))
    assert jnp.allclose(x_val, ref_val, atol=2e-2), \
        float(jnp.max(jnp.abs(x_val - ref_val)))

    print("KERNEL_OK")
</pallas_src>

<mosaic_0001>
module attributes {stable_mosaic.version = 11 : i64} {
  func.func @kernel(%arg0: i32, %arg1: memref<4x128xf32, #tpu.memory_space<vmem>>, %arg2: memref<9x128xf32, #tpu.memory_space<vmem>>, %arg3: memref<9x16x4xf32, #tpu.memory_space<vmem>>, %arg4: memref<16x1xf32, #tpu.memory_space<vmem>>, %arg5: memref<9x64x16xf32, #tpu.memory_space<vmem>>, %arg6: memref<64x1xf32, #tpu.memory_space<vmem>>, %arg7: memref<9x64x64xbf16, #tpu.memory_space<vmem>>, %arg8: memref<64x1xf32, #tpu.memory_space<vmem>>, %arg9: memref<4x64xbf16, #tpu.memory_space<vmem>>, %arg10: memref<4x1xf32, #tpu.memory_space<vmem>>, %arg11: memref<256x192xbf16, #tpu.memory_space<vmem>>, %arg12: memref<1x192xf32, #tpu.memory_space<vmem>>, %arg13: memref<1x64xf32, #tpu.memory_space<vmem>>, %arg14: memref<1x1xf32, #tpu.memory_space<vmem>>, %arg15: memref<2x128xf32, #tpu.memory_space<vmem>>, %arg16: memref<2x256xf32, #tpu.memory_space<vmem>>) attributes {dimension_semantics = [#tpu.dimension_semantics<parallel>], iteration_bounds = array<i64: 1>, scalar_prefetch = 0 : i64, scratch_operands = 1 : i64, tpu.core_type = #tpu.core_type<tc>, window_params = [{transform_indices = @transform_0, window_bounds = array<i64: 4, 128>}, {pipeline_mode = #tpu.pipeline_mode<synchronous>, transform_indices = @transform_1, window_bounds = array<i64: 9, 128>}, {pipeline_mode = #tpu.pipeline_mode<synchronous>, transform_indices = @transform_2, window_bounds = array<i64: 9, 16, 4>}, {pipeline_mode = #tpu.pipeline_mode<synchronous>, transform_indices = @transform_3, window_bounds = array<i64: 16, 1>}, {pipeline_mode = #tpu.pipeline_mode<synchronous>, transform_indices = @transform_4, window_bounds = array<i64: 9, 64, 16>}, {pipeline_mode = #tpu.pipeline_mode<synchronous>, transform_indices = @transform_5, window_bounds = array<i64: 64, 1>}, {pipeline_mode = #tpu.pipeline_mode<synchronous>, transform_indices = @transform_6, window_bounds = array<i64: 9, 64, 64>}, {pipeline_mode = #tpu.pipeline_mode<synchronous>, transform_indices = @transform_7, window_bounds = array<i64: 64, 1>}, {pipeline_mode = #tpu.pipeline_mode<synchronous>, transform_indices = @transform_8, window_bounds = array<i64: 4, 64>}, {pipeline_mode = #tpu.pipeline_mode<synchronous>, transform_indices = @transform_9, window_bounds = array<i64: 4, 1>}, {pipeline_mode = #tpu.pipeline_mode<synchronous>, transform_indices = @transform_10, window_bounds = array<i64: 256, 192>}, {pipeline_mode = #tpu.pipeline_mode<synchronous>, transform_indices = @transform_11, window_bounds = array<i64: 1, 192>}, {pipeline_mode = #tpu.pipeline_mode<synchronous>, transform_indices = @transform_12, window_bounds = array<i64: 1, 64>}, {pipeline_mode = #tpu.pipeline_mode<synchronous>, transform_indices = @transform_13, window_bounds = array<i64: 1, 1>}, {transform_indices = @transform_14, window_bounds = array<i64: 2, 128>}]} {
    %c0 = arith.constant 0 : index
    %c0_0 = arith.constant 0 : index
    %0 = vector.load %arg1[%c0, %c0_0] : memref<4x128xf32, #tpu.memory_space<vmem>>, vector<4x128xf32>
    %cst = arith.constant 0.000000e+00 : f32
    %1 = vector.broadcast %cst : f32 to vector<16x128xf32>
    %c9_i32 = arith.constant 9 : i32
    %2 = tpu.dynamic_rotate %0 by %c9_i32 dim 1 : vector<4x128xf32>, i32 -> vector<4x128xf32>
    %c0_1 = arith.constant 0 : index
    %c0_2 = arith.constant 0 : index
    %3 = vector.load %arg2[%c0_1, %c0_2] : memref<9x128xf32, #tpu.memory_space<vmem>>, vector<1x128xf32>
    %4 = vector.broadcast %3 : vector<1x128xf32> to vector<4x128xf32>
    %5 = arith.mulf %2, %4 : vector<4x128xf32>
    %c0_3 = arith.constant 0 : index
    %c0_4 = arith.constant 0 : index
    %c0_5 = arith.constant 0 : index
    %6 = vector.load %arg3[%c0_3, %c0_4, %c0_5] : memref<9x16x4xf32, #tpu.memory_space<vmem>>, vector<1x16x4xf32>
    %7 = vector.shape_cast %6 : vector<1x16x4xf32> to vector<16x4xf32>
    %cst_6 = arith.constant dense<0.000000e+00> : vector<16x128xf32>
    %8 = tpu.matmul %7, %5, %cst_6 {dimension_numbers = #tpu.dot_dimension_numbers<[1], [0], [0], [1], [0, 0, 1, 1], [], []>} : vector<16x4xf32>, vector<4x128xf32>, vector<16x128xf32> -> vector<16x128xf32>
    %9 = arith.addf %1, %8 : vector<16x128xf32>
    %c8_i32 = arith.constant 8 : i32
    %10 = tpu.dynamic_rotate %0 by %c8_i32 dim 1 : vector<4x128xf32>, i32 -> vector<4x128xf32>
    %c1 = arith.constant 1 : index
    %c0_7 = arith.constant 0 : index
    %11 = vector.load %arg2[%c1, %c0_7] : memref<9x128xf32, #tpu.memory_space<vmem>>, vector<1x128xf32>
    %12 = vector.broadcast %11 : vector<1x128xf32> to vector<4x128xf32>
    %13 = arith.mulf %10, %12 : vector<4x128xf32>
    %c1_8 = arith.constant 1 : index
    %c0_9 = arith.constant 0 : index
    %c0_10 = arith.constant 0 : index
    %14 = vector.load %arg3[%c1_8, %c0_9, %c0_10] : memref<9x16x4xf32, #tpu.memory_space<vmem>>, vector<1x16x4xf32>
    %15 = vector.shape_cast %14 : vector<1x16x4xf32> to vector<16x4xf32>
    %cst_11 = arith.constant dense<0.000000e+00> : vector<16x128xf32>
    %16 = tpu.matmul %15, %13, %cst_11 {dimension_numbers = #tpu.dot_dimension_numbers<[1], [0], [0], [1], [0, 0, 1, 1], [], []>} : vector<16x4xf32>, vector<4x128xf32>, vector<16x128xf32> -> vector<16x128xf32>
    %17 = arith.addf %9, %16 : vector<16x128xf32>
    %c7_i32 = arith.constant 7 : i32
    %18 = tpu.dynamic_rotate %0 by %c7_i32 dim 1 : vector<4x128xf32>, i32 -> vector<4x128xf32>
    %c2 = arith.constant 2 : index
    %c0_12 = arith.constant 0 : index
    %19 = vector.load %arg2[%c2, %c0_12] : memref<9x128xf32, #tpu.memory_space<vmem>>, vector<1x128xf32>
    %20 = vector.broadcast %19 : vector<1x128xf32> to vector<4x128xf32>
    %21 = arith.mulf %18, %20 : vector<4x128xf32>
    %c2_13 = arith.constant 2 : index
    %c0_14 = arith.constant 0 : index
    %c0_15 = arith.constant 0 : index
    %22 = vector.load %arg3[%c2_13, %c0_14, %c0_15] : memref<9x16x4xf32, #tpu.memory_space<vmem>>, vector<1x16x4xf32>
    %23 = vector.shape_cast %22 : vector<1x16x4xf32> to vector<16x4xf32>
    %cst_16 = arith.constant dense<0.000000e+00> : vector<16x128xf32>
    %24 = tpu.matmul %23, %21, %cst_16 {dimension_numbers = #tpu.dot_dimension_numbers<[1], [0], [0], [1], [0, 0, 1, 1], [], []>} : vector<16x4xf32>, vector<4x128xf32>, vector<16x128xf32> -> vector<16x128xf32>
    %25 = arith.addf %17, %24 : vector<16x128xf32>
    %c1_i32 = arith.constant 1 : i32
    %26 = tpu.dynamic_rotate %0 by %c1_i32 dim 1 : vector<4x128xf32>, i32 -> vector<4x128xf32>
    %c3 = arith.constant 3 : index
    %c0_17 = arith.constant 0 : index
    %27 = vector.load %arg2[%c3, %c0_17] : memref<9x128xf32, #tpu.memory_space<vmem>>, vector<1x128xf32>
    %28 = vector.broadcast %27 : vector<1x128xf32> to vector<4x128xf32>
    %29 = arith.mulf %26, %28 : vector<4x128xf32>
    %c3_18 = arith.constant 3 : index
    %c0_19 = arith.constant 0 : index
    %c0_20 = arith.constant 0 : index
    %30 = vector.load %arg3[%c3_18, %c0_19, %c0_20] : memref<9x16x4xf32, #tpu.memory_space<vmem>>, vector<1x16x4xf32>
    %31 = vector.shape_cast %30 : vector<1x16x4xf32> to vector<16x4xf32>
    %cst_21 = arith.constant dense<0.000000e+00> : vector<16x128xf32>
    %32 = tpu.matmul %31, %29, %cst_21 {dimension_numbers = #tpu.dot_dimension_numbers<[1], [0], [0], [1], [0, 0, 1, 1], [], []>} : vector<16x4xf32>, vector<4x128xf32>, vector<16x128xf32> -> vector<16x128xf32>
    %33 = arith.addf %25, %32 : vector<16x128xf32>
    %c4 = arith.constant 4 : index
    %c0_22 = arith.constant 0 : index
    %34 = vector.load %arg2[%c4, %c0_22] : memref<9x128xf32, #tpu.memory_space<vmem>>, vector<1x128xf32>
    %35 = vector.broadcast %34 : vector<1x128xf32> to vector<4x128xf32>
    %36 = arith.mulf %0, %35 : vector<4x128xf32>
    %c4_23 = arith.constant 4 : index
    %c0_24 = arith.constant 0 : index
    %c0_25 = arith.constant 0 : index
    %37 = vector.load %arg3[%c4_23, %c0_24, %c0_25] : memref<9x16x4xf32, #tpu.memory_space<vmem>>, vector<1x16x4xf32>
    %38 = vector.shape_cast %37 : vector<1x16x4xf32> to vector<16x4xf32>
    %cst_26 = arith.constant dense<0.000000e+00> : vector<16x128xf32>
    %39 = tpu.matmul %38, %36, %cst_26 {dimension_numbers = #tpu.dot_dimension_numbers<[1], [0], [0], [1], [0, 0, 1, 1], [], []>} : vector<16x4xf32>, vector<4x128xf32>, vector<16x128xf32> -> vector<16x128xf32>
    %40 = arith.addf %33, %39 : vector<16x128xf32>
    %c127_i32 = arith.constant 127 : i32
    %41 = tpu.dynamic_rotate %0 by %c127_i32 dim 1 : vector<4x128xf32>, i32 -> vector<4x128xf32>
    %c5 = arith.constant 5 : index
    %c0_27 = arith.constant 0 : index
    %42 = vector.load %arg2[%c5, %c0_27] : memref<9x128xf32, #tpu.memory_space<vmem>>, vector<1x128xf32>
    %43 = vector.broadcast %42 : vector<1x128xf32> to vector<4x128xf32>
    %44 = arith.mulf %41, %43 : vector<4x128xf32>
    %c5_28 = arith.constant 5 : index
    %c0_29 = arith.constant 0 : index
    %c0_30 = arith.constant 0 : index
    %45 = vector.load %arg3[%c5_28, %c0_29, %c0_30] : memref<9x16x4xf32, #tpu.memory_space<vmem>>, vector<1x16x4xf32>
    %46 = vector.shape_cast %45 : vector<1x16x4xf32> to vector<16x4xf32>
    %cst_31 = arith.constant dense<0.000000e+00> : vector<16x128xf32>
    %47 = tpu.matmul %46, %44, %cst_31 {dimension_numbers = #tpu.dot_dimension_numbers<[1], [0], [0], [1], [0, 0, 1, 1], [], []>} : vector<16x4xf32>, vector<4x128xf32>, vector<16x128xf32> -> vector<16x128xf32>
    %48 = arith.addf %40, %47 : vector<16x128xf32>
    %c121_i32 = arith.constant 121 : i32
    %49 = tpu.dynamic_rotate %0 by %c121_i32 dim 1 : vector<4x128xf32>, i32 -> vector<4x128xf32>
    %c6 = arith.constant 6 : index
    %c0_32 = arith.constant 0 : index
    %50 = vector.load %arg2[%c6, %c0_32] : memref<9x128xf32, #tpu.memory_space<vmem>>, vector<1x128xf32>
    %51 = vector.broadcast %50 : vector<1x128xf32> to vector<4x128xf32>
    %52 = arith.mulf %49, %51 : vector<4x128xf32>
    %c6_33 = arith.constant 6 : index
    %c0_34 = arith.constant 0 : index
    %c0_35 = arith.constant 0 : index
    %53 = vector.load %arg3[%c6_33, %c0_34, %c0_35] : memref<9x16x4xf32, #tpu.memory_space<vmem>>, vector<1x16x4xf32>
    %54 = vector.shape_cast %53 : vector<1x16x4xf32> to vector<16x4xf32>
    %cst_36 = arith.constant dense<0.000000e+00> : vector<16x128xf32>
    %55 = tpu.matmul %54, %52, %cst_36 {dimension_numbers = #tpu.dot_dimension_numbers<[1], [0], [0], [1], [0, 0, 1, 1], [], []>} : vector<16x4xf32>, vector<4x128xf32>, vector<16x128xf32> -> vector<16x128xf32>
    %56 = arith.addf %48, %55 : vector<16x128xf32>
    %c120_i32 = arith.constant 120 : i32
    %57 = tpu.dynamic_rotate %0 by %c120_i32 dim 1 : vector<4x128xf32>, i32 -> vector<4x128xf32>
    %c7 = arith.constant 7 : index
    %c0_37 = arith.constant 0 : index
    %58 = vector.load %arg2[%c7, %c0_37] : memref<9x128xf32, #tpu.memory_space<vmem>>, vector<1x128xf32>
    %59 = vector.broadcast %58 : vector<1x128xf32> to vector<4x128xf32>
    %60 = arith.mulf %57, %59 : vector<4x128xf32>
    %c7_38 = arith.constant 7 : index
    %c0_39 = arith.constant 0 : index
    %c0_40 = arith.constant 0 : index
    %61 = vector.load %arg3[%c7_38, %c0_39, %c0_40] : memref<9x16x4xf32, #tpu.memory_space<vmem>>, vector<1x16x4xf32>
    %62 = vector.shape_cast %61 : vector<1x16x4xf32> to vector<16x4xf32>
    %cst_41 = arith.constant dense<0.000000e+00> : vector<16x128xf32>
    %63 = tpu.matmul %62, %60, %cst_41 {dimension_numbers = #tpu.dot_dimension_numbers<[1], [0], [0], [1], [0, 0, 1, 1], [], []>} : vector<16x4xf32>, vector<4x128xf32>, vector<16x128xf32> -> vector<16x128xf32>
    %64 = arith.addf %56, %63 : vector<16x128xf32>
    %c119_i32 = arith.constant 119 : i32
    %65 = tpu.dynamic_rotate %0 by %c119_i32 dim 1 : vector<4x128xf32>, i32 -> vector<4x128xf32>
    %c8 = arith.constant 8 : index
    %c0_42 = arith.constant 0 : index
    %66 = vector.load %arg2[%c8, %c0_42] : memref<9x128xf32, #tpu.memory_space<vmem>>, vector<1x128xf32>
    %67 = vector.broadcast %66 : vector<1x128xf32> to vector<4x128xf32>
    %68 = arith.mulf %65, %67 : vector<4x128xf32>
    %c8_43 = arith.constant 8 : index
    %c0_44 = arith.constant 0 : index
    %c0_45 = arith.constant 0 : index
    %69 = vector.load %arg3[%c8_43, %c0_44, %c0_45] : memref<9x16x4xf32, #tpu.memory_space<vmem>>, vector<1x16x4xf32>
    %70 = vector.shape_cast %69 : vector<1x16x4xf32> to vector<16x4xf32>
    %cst_46 = arith.constant dense<0.000000e+00> : vector<16x128xf32>
    %71 = tpu.matmul %70, %68, %cst_46 {dimension_numbers = #tpu.dot_dimension_numbers<[1], [0], [0], [1], [0, 0, 1, 1], [], []>} : vector<16x4xf32>, vector<4x128xf32>, vector<16x128xf32> -> vector<16x128xf32>
    %72 = arith.addf %64, %71 : vector<16x128xf32>
    %c0_47 = arith.constant 0 : index
    %c0_48 = arith.constant 0 : index
    %73 = vector.load %arg4[%c0_47, %c0_48] : memref<16x1xf32, #tpu.memory_space<vmem>>, vector<16x1xf32>
    %74 = vector.broadcast %73 : vector<16x1xf32> to vector<16x128xf32>
    %75 = arith.addf %72, %74 : vector<16x128xf32>
    %cst_49 = arith.constant 0.000000e+00 : f32
    %76 = vector.broadcast %cst_49 : f32 to vector<16x128xf32>
    %77 = arith.maximumf %75, %76 : vector<16x128xf32>
    %cst_50 = arith.constant 0.000000e+00 : f32
    %78 = vector.broadcast %cst_50 : f32 to vector<64x128xf32>
    %c9_i32_51 = arith.constant 9 : i32
    %79 = tpu.dynamic_rotate %77 by %c9_i32_51 dim 1 : vector<16x128xf32>, i32 -> vector<16x128xf32>
    %c0_52 = arith.constant 0 : index
    %c0_53 = arith.constant 0 : index
    %80 = vector.load %arg2[%c0_52, %c0_53] : memref<9x128xf32, #tpu.memory_space<vmem>>, vector<1x128xf32>
    %81 = vector.broadcast %80 : vector<1x128xf32> to vector<16x128xf32>
    %82 = arith.mulf %79, %81 : vector<16x128xf32>
    %c0_54 = arith.constant 0 : index
    %c0_55 = arith.constant 0 : index
    %c0_56 = arith.constant 0 : index
    %83 = vector.load %arg5[%c0_54, %c0_55, %c0_56] : memref<9x64x16xf32, #tpu.memory_space<vmem>>, vector<1x64x16xf32>
    %84 = vector.shape_cast %83 : vector<1x64x16xf32> to vector<64x16xf32>
    %cst_57 = arith.constant dense<0.000000e+00> : vector<64x128xf32>
    %85 = tpu.matmul %84, %82, %cst_57 {dimension_numbers = #tpu.dot_dimension_numbers<[1], [0], [0], [1], [0, 0, 1, 1], [], []>} : vector<64x16xf32>, vector<16x128xf32>, vector<64x128xf32> -> vector<64x128xf32>
    %86 = arith.addf %78, %85 : vector<64x128xf32>
    %c8_i32_58 = arith.constant 8 : i32
    %87 = tpu.dynamic_rotate %77 by %c8_i32_58 dim 1 : vector<16x128xf32>, i32 -> vector<16x128xf32>
    %c1_59 = arith.constant 1 : index
    %c0_60 = arith.constant 0 : index
    %88 = vector.load %arg2[%c1_59, %c0_60] : memref<9x128xf32, #tpu.memory_space<vmem>>, vector<1x128xf32>
    %89 = vector.broadcast %88 : vector<1x128xf32> to vector<16x128xf32>
    %90 = arith.mulf %87, %89 : vector<16x128xf32>
    %c1_61 = arith.constant 1 : index
    %c0_62 = arith.constant 0 : index
    %c0_63 = arith.constant 0 : index
    %91 = vector.load %arg5[%c1_61, %c0_62, %c0_63] : memref<9x64x16xf32, #tpu.memory_space<vmem>>, vector<1x64x16xf32>
    %92 = vector.shape_cast %91 : vector<1x64x16xf32> to vector<64x16xf32>
    %cst_64 = arith.constant dense<0.000000e+00> : vector<64x128xf32>
    %93 = tpu.matmul %92, %90, %cst_64 {dimension_numbers = #tpu.dot_dimension_numbers<[1], [0], [0], [1], [0, 0, 1, 1], [], []>} : vector<64x16xf32>, vector<16x128xf32>, vector<64x128xf32> -> vector<64x128xf32>
    %94 = arith.addf %86, %93 : vector<64x128xf32>
    %c7_i32_65 = arith.constant 7 : i32
    %95 = tpu.dynamic_rotate %77 by %c7_i32_65 dim 1 : vector<16x128xf32>, i32 -> vector<16x128xf32>
    %c2_66 = arith.constant 2 : index
    %c0_67 = arith.constant 0 : index
    %96 = vector.load %arg2[%c2_66, %c0_67] : memref<9x128xf32, #tpu.memory_space<vmem>>, vector<1x128xf32>
    %97 = vector.broadcast %96 : vector<1x128xf32> to vector<16x128xf32>
    %98 = arith.mulf %95, %97 : vector<16x128xf32>
    %c2_68 = arith.constant 2 : index
    %c0_69 = arith.constant 0 : index
    %c0_70 = arith.constant 0 : index
    %99 = vector.load %arg5[%c2_68, %c0_69, %c0_70] : memref<9x64x16xf32, #tpu.memory_space<vmem>>, vector<1x64x16xf32>
    %100 = vector.shape_cast %99 : vector<1x64x16xf32> to vector<64x16xf32>
    %cst_71 = arith.constant dense<0.000000e+00> : vector<64x128xf32>
    %101 = tpu.matmul %100, %98, %cst_71 {dimension_numbers = #tpu.dot_dimension_numbers<[1], [0], [0], [1], [0, 0, 1, 1], [], []>} : vector<64x16xf32>, vector<16x128xf32>, vector<64x128xf32> -> vector<64x128xf32>
    %102 = arith.addf %94, %101 : vector<64x128xf32>
    %c1_i32_72 = arith.constant 1 : i32
    %103 = tpu.dynamic_rotate %77 by %c1_i32_72 dim 1 : vector<16x128xf32>, i32 -> vector<16x128xf32>
    %c3_73 = arith.constant 3 : index
    %c0_74 = arith.constant 0 : index
    %104 = vector.load %arg2[%c3_73, %c0_74] : memref<9x128xf32, #tpu.memory_space<vmem>>, vector<1x128xf32>
    %105 = vector.broadcast %104 : vector<1x128xf32> to vector<16x128xf32>
    %106 = arith.mulf %103, %105 : vector<16x128xf32>
    %c3_75 = arith.constant 3 : index
    %c0_76 = arith.constant 0 : index
    %c0_77 = arith.constant 0 : index
    %107 = vector.load %arg5[%c3_75, %c0_76, %c0_77] : memref<9x64x16xf32, #tpu.memory_space<vmem>>, vector<1x64x16xf32>
    %108 = vector.shape_cast %107 : vector<1x64x16xf32> to vector<64x16xf32>
    %cst_78 = arith.constant dense<0.000000e+00> : vector<64x128xf32>
    %109 = tpu.matmul %108, %106, %cst_78 {dimension_numbers = #tpu.dot_dimension_numbers<[1], [0], [0], [1], [0, 0, 1, 1], [], []>} : vector<64x16xf32>, vector<16x128xf32>, vector<64x128xf32> -> vector<64x128xf32>
    %110 = arith.addf %102, %109 : vector<64x128xf32>
    %c4_79 = arith.constant 4 : index
    %c0_80 = arith.constant 0 : index
    %111 = vector.load %arg2[%c4_79, %c0_80] : memref<9x128xf32, #tpu.memory_space<vmem>>, vector<1x128xf32>
    %112 = vector.broadcast %111 : vector<1x128xf32> to vector<16x128xf32>
    %113 = arith.mulf %77, %112 : vector<16x128xf32>
    %c4_81 = arith.constant 4 : index
    %c0_82 = arith.constant 0 : index
    %c0_83 = arith.constant 0 : index
    %114 = vector.load %arg5[%c4_81, %c0_82, %c0_83] : memref<9x64x16xf32, #tpu.memory_space<vmem>>, vector<1x64x16xf32>
    %115 = vector.shape_cast %114 : vector<1x64x16xf32> to vector<64x16xf32>
    %cst_84 = arith.constant dense<0.000000e+00> : vector<64x128xf32>
    %116 = tpu.matmul %115, %113, %cst_84 {dimension_numbers = #tpu.dot_dimension_numbers<[1], [0], [0], [1], [0, 0, 1, 1], [], []>} : vector<64x16xf32>, vector<16x128xf32>, vector<64x128xf32> -> vector<64x128xf32>
    %117 = arith.addf %110, %116 : vector<64x128xf32>
    %c127_i32_85 = arith.constant 127 : i32
    %118 = tpu.dynamic_rotate %77 by %c127_i32_85 dim 1 : vector<16x128xf32>, i32 -> vector<16x128xf32>
    %c5_86 = arith.constant 5 : index
    %c0_87 = arith.constant 0 : index
    %119 = vector.load %arg2[%c5_86, %c0_87] : memref<9x128xf32, #tpu.memory_space<vmem>>, vector<1x128xf32>
    %120 = vector.broadcast %119 : vector<1x128xf32> to vector<16x128xf32>
    %121 = arith.mulf %118, %120 : vector<16x128xf32>
    %c5_88 = arith.constant 5 : index
    %c0_89 = arith.constant 0 : index
    %c0_90 = arith.constant 0 : index
    %122 = vector.load %arg5[%c5_88, %c0_89, %c0_90] : memref<9x64x16xf32, #tpu.memory_space<vmem>>, vector<1x64x16xf32>
    %123 = vector.shape_cast %122 : vector<1x64x16xf32> to vector<64x16xf32>
    %cst_91 = arith.constant dense<0.000000e+00> : vector<64x128xf32>
    %124 = tpu.matmul %123, %121, %cst_91 {dimension_numbers = #tpu.dot_dimension_numbers<[1], [0], [0], [1], [0, 0, 1, 1], [], []>} : vector<64x16xf32>, vector<16x128xf32>, vector<64x128xf32> -> vector<64x128xf32>
    %125 = arith.addf %117, %124 : vector<64x128xf32>
    %c121_i32_92 = arith.constant 121 : i32
    %126 = tpu.dynamic_rotate %77 by %c121_i32_92 dim 1 : vector<16x128xf32>, i32 -> vector<16x128xf32>
    %c6_93 = arith.constant 6 : index
    %c0_94 = arith.constant 0 : index
    %127 = vector.load %arg2[%c6_93, %c0_94] : memref<9x128xf32, #tpu.memory_space<vmem>>, vector<1x128xf32>
    %128 = vector.broadcast %127 : vector<1x128xf32> to vector<16x128xf32>
    %129 = arith.mulf %126, %128 : vector<16x128xf32>
    %c6_95 = arith.constant 6 : index
    %c0_96 = arith.constant 0 : index
    %c0_97 = arith.constant 0 : index
    %130 = vector.load %arg5[%c6_95, %c0_96, %c0_97] : memref<9x64x16xf32, #tpu.memory_space<vmem>>, vector<1x64x16xf32>
    %131 = vector.shape_cast %130 : vector<1x64x16xf32> to vector<64x16xf32>
    %cst_98 = arith.constant dense<0.000000e+00> : vector<64x128xf32>
    %132 = tpu.matmul %131, %129, %cst_98 {dimension_numbers = #tpu.dot_dimension_numbers<[1], [0], [0], [1], [0, 0, 1, 1], [], []>} : vector<64x16xf32>, vector<16x128xf32>, vector<64x128xf32> -> vector<64x128xf32>
    %133 = arith.addf %125, %132 : vector<64x128xf32>
    %c120_i32_99 = arith.constant 120 : i32
    %134 = tpu.dynamic_rotate %77 by %c120_i32_99 dim 1 : vector<16x128xf32>, i32 -> vector<16x128xf32>
    %c7_100 = arith.constant 7 : index
    %c0_101 = arith.constant 0 : index
    %135 = vector.load %arg2[%c7_100, %c0_101] : memref<9x128xf32, #tpu.memory_space<vmem>>, vector<1x128xf32>
    %136 = vector.broadcast %135 : vector<1x128xf32> to vector<16x128xf32>
    %137 = arith.mulf %134, %136 : vector<16x128xf32>
    %c7_102 = arith.constant 7 : index
    %c0_103 = arith.constant 0 : index
    %c0_104 = arith.constant 0 : index
    %138 = vector.load %arg5[%c7_102, %c0_103, %c0_104] : memref<9x64x16xf32, #tpu.memory_space<vmem>>, vector<1x64x16xf32>
    %139 = vector.shape_cast %138 : vector<1x64x16xf32> to vector<64x16xf32>
    %cst_105 = arith.constant dense<0.000000e+00> : vector<64x128xf32>
    %140 = tpu.matmul %139, %137, %cst_105 {dimension_numbers = #tpu.dot_dimension_numbers<[1], [0], [0], [1], [0, 0, 1, 1], [], []>} : vector<64x16xf32>, vector<16x128xf32>, vector<64x128xf32> -> vector<64x128xf32>
    %141 = arith.addf %133, %140 : vector<64x128xf32>
    %c119_i32_106 = arith.constant 119 : i32
    %142 = tpu.dynamic_rotate %77 by %c119_i32_106 dim 1 : vector<16x128xf32>, i32 -> vector<16x128xf32>
    %c8_107 = arith.constant 8 : index
    %c0_108 = arith.constant 0 : index
    %143 = vector.load %arg2[%c8_107, %c0_108] : memref<9x128xf32, #tpu.memory_space<vmem>>, vector<1x128xf32>
    %144 = vector.broadcast %143 : vector<1x128xf32> to vector<16x128xf32>
    %145 = arith.mulf %142, %144 : vector<16x128xf32>
    %c8_109 = arith.constant 8 : index
    %c0_110 = arith.constant 0 : index
    %c0_111 = arith.constant 0 : index
    %146 = vector.load %arg5[%c8_109, %c0_110, %c0_111] : memref<9x64x16xf32, #tpu.memory_space<vmem>>, vector<1x64x16xf32>
    %147 = vector.shape_cast %146 : vector<1x64x16xf32> to vector<64x16xf32>
    %cst_112 = arith.constant dense<0.000000e+00> : vector<64x128xf32>
    %148 = tpu.matmul %147, %145, %cst_112 {dimension_numbers = #tpu.dot_dimension_numbers<[1], [0], [0], [1], [0, 0, 1, 1], [], []>} : vector<64x16xf32>, vector<16x128xf32>, vector<64x128xf32> -> vector<64x128xf32>
    %149 = arith.addf %141, %148 : vector<64x128xf32>
    %c0_113 = arith.constant 0 : index
    %c0_114 = arith.constant 0 : index
    %150 = vector.load %arg6[%c0_113, %c0_114] : memref<64x1xf32, #tpu.memory_space<vmem>>, vector<64x1xf32>
    %151 = vector.broadcast %150 : vector<64x1xf32> to vector<64x128xf32>
    %152 = arith.addf %149, %151 : vector<64x128xf32>
    %cst_115 = arith.constant 0.000000e+00 : f32
    %153 = vector.broadcast %cst_115 : f32 to vector<64x128xf32>
    %154 = arith.maximumf %152, %153 : vector<64x128xf32>
    %cst_116 = arith.constant 0.000000e+00 : f32
    %155 = vector.broadcast %cst_116 : f32 to vector<64x128xf32>
    %c9_i32_117 = arith.constant 9 : i32
    %156 = tpu.dynamic_rotate %154 by %c9_i32_117 dim 1 : vector<64x128xf32>, i32 -> vector<64x128xf32>
    %c0_118 = arith.constant 0 : index
    %c0_119 = arith.constant 0 : index
    %157 = vector.load %arg2[%c0_118, %c0_119] : memref<9x128xf32, #tpu.memory_space<vmem>>, vector<1x128xf32>
    %158 = vector.broadcast %157 : vector<1x128xf32> to vector<64x128xf32>
    %159 = arith.mulf %156, %158 : vector<64x128xf32>
    %160 = arith.truncf %159 : vector<64x128xf32> to vector<64x128xbf16>
    %c0_120 = arith.constant 0 : index
    %c0_121 = arith.constant 0 : index
    %c0_122 = arith.constant 0 : index
    %161 = vector.load %arg7[%c0_120, %c0_121, %c0_122] : memref<9x64x64xbf16, #tpu.memory_space<vmem>>, vector<1x64x64xbf16>
    %162 = vector.shape_cast %161 : vector<1x64x64xbf16> to vector<64x64xbf16>
    %cst_123 = arith.constant dense<0.000000e+00> : vector<64x128xf32>
    %163 = tpu.matmul %162, %160, %cst_123 {dimension_numbers = #tpu.dot_dimension_numbers<[1], [0], [0], [1], [0, 0, 1, 1], [], []>} : vector<64x64xbf16>, vector<64x128xbf16>, vector<64x128xf32> -> vector<64x128xf32>
    %164 = arith.addf %155, %163 : vector<64x128xf32>
    %c8_i32_124 = arith.constant 8 : i32
    %165 = tpu.dynamic_rotate %154 by %c8_i32_124 dim 1 : vector<64x128xf32>, i32 -> vector<64x128xf32>
    %c1_125 = arith.constant 1 : index
    %c0_126 = arith.constant 0 : index
    %166 = vector.load %arg2[%c1_125, %c0_126] : memref<9x128xf32, #tpu.memory_space<vmem>>, vector<1x128xf32>
    %167 = vector.broadcast %166 : vector<1x128xf32> to vector<64x128xf32>
    %168 = arith.mulf %165, %167 : vector<64x128xf32>
    %169 = arith.truncf %168 : vector<64x128xf32> to vector<64x128xbf16>
    %c1_127 = arith.constant 1 : index
    %c0_128 = arith.constant 0 : index
    %c0_129 = arith.constant 0 : index
    %170 = vector.load %arg7[%c1_127, %c0_128, %c0_129] : memref<9x64x64xbf16, #tpu.memory_space<vmem>>, vector<1x64x64xbf16>
    %171 = vector.shape_cast %170 : vector<1x64x64xbf16> to vector<64x64xbf16>
    %cst_130 = arith.constant dense<0.000000e+00> : vector<64x128xf32>
    %172 = tpu.matmul %171, %169, %cst_130 {dimension_numbers = #tpu.dot_dimension_numbers<[1], [0], [0], [1], [0, 0, 1, 1], [], []>} : vector<64x64xbf16>, vector<64x128xbf16>, vector<64x128xf32> -> vector<64x128xf32>
    %173 = arith.addf %164, %172 : vector<64x128xf32>
    %c7_i32_131 = arith.constant 7 : i32
    %174 = tpu.dynamic_rotate %154 by %c7_i32_131 dim 1 : vector<64x128xf32>, i32 -> vector<64x128xf32>
    %c2_132 = arith.constant 2 : index
    %c0_133 = arith.constant 0 : index
    %175 = vector.load %arg2[%c2_132, %c0_133] : memref<9x128xf32, #tpu.memory_space<vmem>>, vector<1x128xf32>
    %176 = vector.broadcast %175 : vector<1x128xf32> to vector<64x128xf32>
    %177 = arith.mulf %174, %176 : vector<64x128xf32>
    %178 = arith.truncf %177 : vector<64x128xf32> to vector<64x128xbf16>
    %c2_134 = arith.constant 2 : index
    %c0_135 = arith.constant 0 : index
    %c0_136 = arith.constant 0 : index
    %179 = vector.load %arg7[%c2_134, %c0_135, %c0_136] : memref<9x64x64xbf16, #tpu.memory_space<vmem>>, vector<1x64x64xbf16>
    %180 = vector.shape_cast %179 : vector<1x64x64xbf16> to vector<64x64xbf16>
    %cst_137 = arith.constant dense<0.000000e+00> : vector<64x128xf32>
    %181 = tpu.matmul %180, %178, %cst_137 {dimension_numbers = #tpu.dot_dimension_numbers<[1], [0], [0], [1], [0, 0, 1, 1], [], []>} : vector<64x64xbf16>, vector<64x128xbf16>, vector<64x128xf32> -> vector<64x128xf32>
    %182 = arith.addf %173, %181 : vector<64x128xf32>
    %c1_i32_138 = arith.constant 1 : i32
    %183 = tpu.dynamic_rotate %154 by %c1_i32_138 dim 1 : vector<64x128xf32>, i32 -> vector<64x128xf32>
    %c3_139 = arith.constant 3 : index
    %c0_140 = arith.constant 0 : index
    %184 = vector.load %arg2[%c3_139, %c0_140] : memref<9x128xf32, #tpu.memory_space<vmem>>, vector<1x128xf32>
    %185 = vector.broadcast %184 : vector<1x128xf32> to vector<64x128xf32>
    %186 = arith.mulf %183, %185 : vector<64x128xf32>
    %187 = arith.truncf %186 : vector<64x128xf32> to vector<64x128xbf16>
    %c3_141 = arith.constant 3 : index
    %c0_142 = arith.constant 0 : index
    %c0_143 = arith.constant 0 : index
    %188 = vector.load %arg7[%c3_141, %c0_142, %c0_143] : memref<9x64x64xbf16, #tpu.memory_space<vmem>>, vector<1x64x64xbf16>
    %189 = vector.shape_cast %188 : vector<1x64x64xbf16> to vector<64x64xbf16>
    %cst_144 = arith.constant dense<0.000000e+00> : vector<64x128xf32>
    %190 = tpu.matmul %189, %187, %cst_144 {dimension_numbers = #tpu.dot_dimension_numbers<[1], [0], [0], [1], [0, 0, 1, 1], [], []>} : vector<64x64xbf16>, vector<64x128xbf16>, vector<64x128xf32> -> vector<64x128xf32>
    %191 = arith.addf %182, %190 : vector<64x128xf32>
    %c4_145 = arith.constant 4 : index
    %c0_146 = arith.constant 0 : index
    %192 = vector.load %arg2[%c4_145, %c0_146] : memref<9x128xf32, #tpu.memory_space<vmem>>, vector<1x128xf32>
    %193 = vector.broadcast %192 : vector<1x128xf32> to vector<64x128xf32>
    %194 = arith.mulf %154, %193 : vector<64x128xf32>
    %195 = arith.truncf %194 : vector<64x128xf32> to vector<64x128xbf16>
    %c4_147 = arith.constant 4 : index
    %c0_148 = arith.constant 0 : index
    %c0_149 = arith.constant 0 : index
    %196 = vector.load %arg7[%c4_147, %c0_148, %c0_149] : memref<9x64x64xbf16, #tpu.memory_space<vmem>>, vector<1x64x64xbf16>
    %197 = vector.shape_cast %196 : vector<1x64x64xbf16> to vector<64x64xbf16>
    %cst_150 = arith.constant dense<0.000000e+00> : vector<64x128xf32>
    %198 = tpu.matmul %197, %195, %cst_150 {dimension_numbers = #tpu.dot_dimension_numbers<[1], [0], [0], [1], [0, 0, 1, 1], [], []>} : vector<64x64xbf16>, vector<64x128xbf16>, vector<64x128xf32> -> vector<64x128xf32>
    %199 = arith.addf %191, %198 : vector<64x128xf32>
    %c127_i32_151 = arith.constant 127 : i32
    %200 = tpu.dynamic_rotate %154 by %c127_i32_151 dim 1 : vector<64x128xf32>, i32 -> vector<64x128xf32>
    %c5_152 = arith.constant 5 : index
    %c0_153 = arith.constant 0 : index
    %201 = vector.load %arg2[%c5_152, %c0_153] : memref<9x128xf32, #tpu.memory_space<vmem>>, vector<1x128xf32>
    %202 = vector.broadcast %201 : vector<1x128xf32> to vector<64x128xf32>
    %203 = arith.mulf %200, %202 : vector<64x128xf32>
    %204 = arith.truncf %203 : vector<64x128xf32> to vector<64x128xbf16>
    %c5_154 = arith.constant 5 : index
    %c0_155 = arith.constant 0 : index
    %c0_156 = arith.constant 0 : index
    %205 = vector.load %arg7[%c5_154, %c0_155, %c0_156] : memref<9x64x64xbf16, #tpu.memory_space<vmem>>, vector<1x64x64xbf16>
    %206 = vector.shape_cast %205 : vector<1x64x64xbf16> to vector<64x64xbf16>
    %cst_157 = arith.constant dense<0.000000e+00> : vector<64x128xf32>
    %207 = tpu.matmul %206, %204, %cst_157 {dimension_numbers = #tpu.dot_dimension_numbers<[1], [0], [0], [1], [0, 0, 1, 1], [], []>} : vector<64x64xbf16>, vector<64x128xbf16>, vector<64x128xf32> -> vector<64x128xf32>
    %208 = arith.addf %199, %207 : vector<64x128xf32>
    %c121_i32_158 = arith.constant 121 : i32
    %209 = tpu.dynamic_rotate %154 by %c121_i32_158 dim 1 : vector<64x128xf32>, i32 -> vector<64x128xf32>
    %c6_159 = arith.constant 6 : index
    %c0_160 = arith.constant 0 : index
    %210 = vector.load %arg2[%c6_159, %c0_160] : memref<9x128xf32, #tpu.memory_space<vmem>>, vector<1x128xf32>
    %211 = vector.broadcast %210 : vector<1x128xf32> to vector<64x128xf32>
    %212 = arith.mulf %209, %211 : vector<64x128xf32>
    %213 = arith.truncf %212 : vector<64x128xf32> to vector<64x128xbf16>
    %c6_161 = arith.constant 6 : index
    %c0_162 = arith.constant 0 : index
    %c0_163 = arith.constant 0 : index
    %214 = vector.load %arg7[%c6_161, %c0_162, %c0_163] : memref<9x64x64xbf16, #tpu.memory_space<vmem>>, vector<1x64x64xbf16>
    %215 = vector.shape_cast %214 : vector<1x64x64xbf16> to vector<64x64xbf16>
    %cst_164 = arith.constant dense<0.000000e+00> : vector<64x128xf32>
    %216 = tpu.matmul %215, %213, %cst_164 {dimension_numbers = #tpu.dot_dimension_numbers<[1], [0], [0], [1], [0, 0, 1, 1], [], []>} : vector<64x64xbf16>, vector<64x128xbf16>, vector<64x128xf32> -> vector<64x128xf32>
    %217 = arith.addf %208, %216 : vector<64x128xf32>
    %c120_i32_165 = arith.constant 120 : i32
    %218 = tpu.dynamic_rotate %154 by %c120_i32_165 dim 1 : vector<64x128xf32>, i32 -> vector<64x128xf32>
    %c7_166 = arith.constant 7 : index
    %c0_167 = arith.constant 0 : index
    %219 = vector.load %arg2[%c7_166, %c0_167] : memref<9x128xf32, #tpu.memory_space<vmem>>, vector<1x128xf32>
    %220 = vector.broadcast %219 : vector<1x128xf32> to vector<64x128xf32>
    %221 = arith.mulf %218, %220 : vector<64x128xf32>
    %222 = arith.truncf %221 : vector<64x128xf32> to vector<64x128xbf16>
    %c7_168 = arith.constant 7 : index
    %c0_169 = arith.constant 0 : index
    %c0_170 = arith.constant 0 : index
    %223 = vector.load %arg7[%c7_168, %c0_169, %c0_170] : memref<9x64x64xbf16, #tpu.memory_space<vmem>>, vector<1x64x64xbf16>
    %224 = vector.shape_cast %223 : vector<1x64x64xbf16> to vector<64x64xbf16>
    %cst_171 = arith.constant dense<0.000000e+00> : vector<64x128xf32>
    %225 = tpu.matmul %224, %222, %cst_171 {dimension_numbers = #tpu.dot_dimension_numbers<[1], [0], [0], [1], [0, 0, 1, 1], [], []>} : vector<64x64xbf16>, vector<64x128xbf16>, vector<64x128xf32> -> vector<64x128xf32>
    %226 = arith.addf %217, %225 : vector<64x128xf32>
    %c119_i32_172 = arith.constant 119 : i32
    %227 = tpu.dynamic_rotate %154 by %c119_i32_172 dim 1 : vector<64x128xf32>, i32 -> vector<64x128xf32>
    %c8_173 = arith.constant 8 : index
    %c0_174 = arith.constant 0 : index
    %228 = vector.load %arg2[%c8_173, %c0_174] : memref<9x128xf32, #tpu.memory_space<vmem>>, vector<1x128xf32>
    %229 = vector.broadcast %228 : vector<1x128xf32> to vector<64x128xf32>
    %230 = arith.mulf %227, %229 : vector<64x128xf32>
    %231 = arith.truncf %230 : vector<64x128xf32> to vector<64x128xbf16>
    %c8_175 = arith.constant 8 : index
    %c0_176 = arith.constant 0 : index
    %c0_177 = arith.constant 0 : index
    %232 = vector.load %arg7[%c8_175, %c0_176, %c0_177] : memref<9x64x64xbf16, #tpu.memory_space<vmem>>, vector<1x64x64xbf16>
    %233 = vector.shape_cast %232 : vector<1x64x64xbf16> to vector<64x64xbf16>
    %cst_178 = arith.constant dense<0.000000e+00> : vector<64x128xf32>
    %234 = tpu.matmul %233, %231, %cst_178 {dimension_numbers = #tpu.dot_dimension_numbers<[1], [0], [0], [1], [0, 0, 1, 1], [], []>} : vector<64x64xbf16>, vector<64x128xbf16>, vector<64x128xf32> -> vector<64x128xf32>
    %235 = arith.addf %226, %234 : vector<64x128xf32>
    %c0_179 = arith.constant 0 : index
    %c0_180 = arith.constant 0 : index
    %236 = vector.load %arg8[%c0_179, %c0_180] : memref<64x1xf32, #tpu.memory_space<vmem>>, vector<64x1xf32>
    %237 = vector.broadcast %236 : vector<64x1xf32> to vector<64x128xf32>
    %238 = arith.addf %235, %237 : vector<64x128xf32>
    %cst_181 = arith.constant 0.000000e+00 : f32
    %239 = vector.broadcast %cst_181 : f32 to vector<64x128xf32>
    %240 = arith.maximumf %238, %239 : vector<64x128xf32>
    %c0_182 = arith.constant 0 : index
    %c0_183 = arith.constant 0 : index
    %241 = vector.load %arg9[%c0_182, %c0_183] : memref<4x64xbf16, #tpu.memory_space<vmem>>, vector<4x64xbf16>
    %242 = arith.truncf %240 : vector<64x128xf32> to vector<64x128xbf16>
    %cst_184 = arith.constant dense<0.000000e+00> : vector<4x128xf32>
    %243 = tpu.matmul %241, %242, %cst_184 {dimension_numbers = #tpu.dot_dimension_numbers<[1], [0], [0], [1], [0, 0, 1, 1], [], []>} : vector<4x64xbf16>, vector<64x128xbf16>, vector<4x128xf32> -> vector<4x128xf32>
    %c0_185 = arith.constant 0 : index
    %c0_186 = arith.constant 0 : index
    %244 = vector.load %arg10[%c0_185, %c0_186] : memref<4x1xf32, #tpu.memory_space<vmem>>, vector<4x1xf32>
    %245 = vector.broadcast %244 : vector<4x1xf32> to vector<4x128xf32>
    %246 = arith.addf %243, %245 : vector<4x128xf32>
    %cst_187 = arith.constant 0.000000e+00 : f32
    %247 = vector.broadcast %cst_187 : f32 to vector<4x128xf32>
    %248 = arith.maximumf %246, %247 : vector<4x128xf32>
    %249 = vector.extract_strided_slice %248 {offsets = [0, 0], sizes = [1, 64], strides = [1, 1]} : vector<4x128xf32> to vector<1x64xf32>
    %c0_188 = arith.constant 0 : index
    %c0_189 = arith.constant 0 : index
    %250 = vector.load %arg16[%c0_188, %c0_189] : memref<2x256xf32, #tpu.memory_space<vmem>>, vector<1x64xf32>
    tpu.vector_store %arg16[%c0_188, %c0_189], %249 {strides = array<i32>} : memref<2x256xf32, #tpu.memory_space<vmem>>, vector<1x64xf32>,
    %251 = vector.extract_strided_slice %248 {offsets = [1, 0], sizes = [1, 64], strides = [1, 1]} : vector<4x128xf32> to vector<1x64xf32>
    %c0_190 = arith.constant 0 : index
    %c64 = arith.constant 64 : index
    %252 = vector.load %arg16[%c0_190, %c64] : memref<2x256xf32, #tpu.memory_space<vmem>>, vector<1x64xf32>
    tpu.vector_store %arg16[%c0_190, %c64], %251 {strides = array<i32>} : memref<2x256xf32, #tpu.memory_space<vmem>>, vector<1x64xf32>,
    %253 = vector.extract_strided_slice %248 {offsets = [2, 0], sizes = [1, 64], strides = [1, 1]} : vector<4x128xf32> to vector<1x64xf32>
    %c0_191 = arith.constant 0 : index
    %c128 = arith.constant 128 : index
    %254 = vector.load %arg16[%c0_191, %c128] : memref<2x256xf32, #tpu.memory_space<vmem>>, vector<1x64xf32>
    tpu.vector_store %arg16[%c0_191, %c128], %253 {strides = array<i32>} : memref<2x256xf32, #tpu.memory_space<vmem>>, vector<1x64xf32>,
    %255 = vector.extract_strided_slice %248 {offsets = [3, 0], sizes = [1, 64], strides = [1, 1]} : vector<4x128xf32> to vector<1x64xf32>
    %c0_192 = arith.constant 0 : index
    %c192 = arith.constant 192 : index
    %256 = vector.load %arg16[%c0_192, %c192] : memref<2x256xf32, #tpu.memory_space<vmem>>, vector<1x64xf32>
    tpu.vector_store %arg16[%c0_192, %c192], %255 {strides = array<i32>} : memref<2x256xf32, #tpu.memory_space<vmem>>, vector<1x64xf32>,
    %257 = vector.extract_strided_slice %248 {offsets = [0, 64], sizes = [1, 64], strides = [1, 1]} : vector<4x128xf32> to vector<1x64xf32>
    %c1_193 = arith.constant 1 : index
    %c0_194 = arith.constant 0 : index
    %258 = vector.load %arg16[%c1_193, %c0_194] : memref<2x256xf32, #tpu.memory_space<vmem>>, vector<1x64xf32>
    tpu.vector_store %arg16[%c1_193, %c0_194], %257 {strides = array<i32>} : memref<2x256xf32, #tpu.memory_space<vmem>>, vector<1x64xf32>,
    %259 = vector.extract_strided_slice %248 {offsets = [1, 64], sizes = [1, 64], strides = [1, 1]} : vector<4x128xf32> to vector<1x64xf32>
    %c1_195 = arith.constant 1 : index
    %c64_196 = arith.constant 64 : index
    %260 = vector.load %arg16[%c1_195, %c64_196] : memref<2x256xf32, #tpu.memory_space<vmem>>, vector<1x64xf32>
    tpu.vector_store %arg16[%c1_195, %c64_196], %259 {strides = array<i32>} : memref<2x256xf32, #tpu.memory_space<vmem>>, vector<1x64xf32>,
    %261 = vector.extract_strided_slice %248 {offsets = [2, 64], sizes = [1, 64], strides = [1, 1]} : vector<4x128xf32> to vector<1x64xf32>
    %c1_197 = arith.constant 1 : index
    %c128_198 = arith.constant 128 : index
    %262 = vector.load %arg16[%c1_197, %c128_198] : memref<2x256xf32, #tpu.memory_space<vmem>>, vector<1x64xf32>
    tpu.vector_store %arg16[%c1_197, %c128_198], %261 {strides = array<i32>} : memref<2x256xf32, #tpu.memory_space<vmem>>, vector<1x64xf32>,
    %263 = vector.extract_strided_slice %248 {offsets = [3, 64], sizes = [1, 64], strides = [1, 1]} : vector<4x128xf32> to vector<1x64xf32>
    %c1_199 = arith.constant 1 : index
    %c192_200 = arith.constant 192 : index
    %264 = vector.load %arg16[%c1_199, %c192_200] : memref<2x256xf32, #tpu.memory_space<vmem>>, vector<1x64xf32>
    tpu.vector_store %arg16[%c1_199, %c192_200], %263 {strides = array<i32>} : memref<2x256xf32, #tpu.memory_space<vmem>>, vector<1x64xf32>,
    %c0_201 = arith.constant 0 : index
    %c0_202 = arith.constant 0 : index
    %265 = vector.load %arg16[%c0_201, %c0_202] : memref<2x256xf32, #tpu.memory_space<vmem>>, vector<2x256xf32>
    %266 = arith.truncf %265 : vector<2x256xf32> to vector<2x256xbf16>
    %c0_203 = arith.constant 0 : index
    %c0_204 = arith.constant 0 : index
    %267 = vector.load %arg11[%c0_203, %c0_204] : memref<256x192xbf16, #tpu.memory_space<vmem>>, vector<256x192xbf16>
    %cst_205 = arith.constant dense<0.000000e+00> : vector<2x192xf32>
    %268 = tpu.matmul %266, %267, %cst_205 {dimension_numbers = #tpu.dot_dimension_numbers<[1], [0], [0], [1], [0, 0, 1, 1], [], []>} : vector<2x256xbf16>, vector<256x192xbf16>, vector<2x192xf32> -> vector<2x192xf32>
    %c0_206 = arith.constant 0 : index
    %c0_207 = arith.constant 0 : index
    %269 = vector.load %arg12[%c0_206, %c0_207] : memref<1x192xf32, #tpu.memory_space<vmem>>, vector<1x192xf32>
    %270 = vector.broadcast %269 : vector<1x192xf32> to vector<2x192xf32>
    %271 = arith.addf %268, %270 : vector<2x192xf32>
    %272 = vector.extract_strided_slice %271 {offsets = [0, 0], sizes = [2, 128], strides = [1, 1]} : vector<2x192xf32> to vector<2x128xf32>
    %cst_208 = arith.constant dense<0xFF800000> : vector<2xf32>
    %273 = vector.multi_reduction <maximumf>, %272, %cst_208 [1] : vector<2x128xf32> to vector<2xf32>
    %274 = vector.shape_cast %273 : vector<2xf32> to vector<2x1xf32>
    %275 = vector.broadcast %274 : vector<2x1xf32> to vector<2x128xf32>
    %276 = arith.subf %272, %275 : vector<2x128xf32>
    %277 = math.exp %276 : vector<2x128xf32>
    %cst_209 = arith.constant dense<0.000000e+00> : vector<2xf32>
    %278 = vector.multi_reduction <add>, %277, %cst_209 [1] : vector<2x128xf32> to vector<2xf32>
    %279 = vector.shape_cast %278 : vector<2xf32> to vector<2x1xf32>
    %280 = vector.broadcast %279 : vector<2x1xf32> to vector<2x128xf32>
    %281 = arith.divf %277, %280 : vector<2x128xf32>
    %282 = vector.extract_strided_slice %271 {offsets = [0, 128], sizes = [2, 64], strides = [1, 1]} : vector<2x192xf32> to vector<2x64xf32>
    %cst_210 = arith.constant 0.000000e+00 : f32
    %283 = vector.broadcast %cst_210 : f32 to vector<2x64xf32>
    %284 = arith.maximumf %282, %283 : vector<2x64xf32>
    %c0_211 = arith.constant 0 : index
    %c0_212 = arith.constant 0 : index
    %285 = vector.load %arg13[%c0_211, %c0_212] : memref<1x64xf32, #tpu.memory_space<vmem>>, vector<1x64xf32>
    %286 = vector.broadcast %285 : vector<1x64xf32> to vector<2x64xf32>
    %287 = arith.mulf %284, %286 : vector<2x64xf32>
    %cst_213 = arith.constant dense<0.000000e+00> : vector<2xf32>
    %288 = vector.multi_reduction <add>, %287, %cst_213 [1] : vector<2x64xf32> to vector<2xf32>
    %289 = vector.shape_cast %288 : vector<2xf32> to vector<2x1xf32>
    %c0_214 = arith.constant 0 : index
    %c0_215 = arith.constant 0 : index
    %290 = vector.load %arg14[%c0_214, %c0_215] : memref<1x1xf32, #tpu.memory_space<vmem>>, vector<1x1xf32>
    %291 = vector.broadcast %290 : vector<1x1xf32> to vector<2x1xf32>
    %292 = arith.addf %289, %291 : vector<2x1xf32>
    %293 = tpu.iota {dimensions = array<i32: 1>} : vector<1x128xi32>
    %c16_i32 = arith.constant 16 : i32
    %294 = vector.broadcast %c16_i32 : i32 to vector<1x128xi32>
    %295 = arith.cmpi eq, %293, %294 : vector<1x128xi32>
    %296 = arith.extui %295 : vector<1x128xi1> to vector<1x128xi32>
    %297 = arith.sitofp %296 : vector<1x128xi32> to vector<1x128xf32>
    %298 = vector.broadcast %292 : vector<2x1xf32> to vector<2x128xf32>
    %299 = vector.broadcast %297 : vector<1x128xf32> to vector<2x128xf32>
    %300 = arith.mulf %298, %299 : vector<2x128xf32>
    %301 = arith.addf %281, %300 : vector<2x128xf32>
    %c0_216 = arith.constant 0 : index
    %c0_217 = arith.constant 0 : index
    %302 = vector.load %arg15[%c0_216, %c0_217] : memref<2x128xf32, #tpu.memory_space<vmem>>, vector<2x128xf32>
    tpu.vector_store %arg15[%c0_216, %c0_217], %301 {strides = array<i32>} : memref<2x128xf32, #tpu.memory_space<vmem>>, vector<2x128xf32>,
    return
  }
  func.func @transform_0(%arg0: i32) -> (i32, i32) {
    %c0_i32 = arith.constant 0 : i32
    %c0_i32_0 = arith.constant 0 : i32
    return %c0_i32, %arg0 : i32, i32
  }
  func.func @transform_1(%arg0: i32) -> (i32, i32) {
    %c0_i32 = arith.constant 0 : i32
    %c0_i32_0 = arith.constant 0 : i32
    %c0_i32_1 = arith.constant 0 : i32
    return %c0_i32, %c0_i32_0 : i32, i32
  }
  func.func @transform_2(%arg0: i32) -> (i32, i32, i32) {
    %c0_i32 = arith.constant 0 : i32
    %c0_i32_0 = arith.constant 0 : i32
    %c0_i32_1 = arith.constant 0 : i32
    %c0_i32_2 = arith.constant 0 : i32
    return %c0_i32, %c0_i32_0, %c0_i32_1 : i32, i32, i32
  }
  func.func @transform_3(%arg0: i32) -> (i32, i32) {
    %c0_i32 = arith.constant 0 : i32
    %c0_i32_0 = arith.constant 0 : i32
    %c0_i32_1 = arith.constant 0 : i32
    return %c0_i32, %c0_i32_0 : i32, i32
  }
  func.func @transform_4(%arg0: i32) -> (i32, i32, i32) {
    %c0_i32 = arith.constant 0 : i32
    %c0_i32_0 = arith.constant 0 : i32
    %c0_i32_1 = arith.constant 0 : i32
    %c0_i32_2 = arith.constant 0 : i32
    return %c0_i32, %c0_i32_0, %c0_i32_1 : i32, i32, i32
  }
  func.func @transform_5(%arg0: i32) -> (i32, i32) {
    %c0_i32 = arith.constant 0 : i32
    %c0_i32_0 = arith.constant 0 : i32
    %c0_i32_1 = arith.constant 0 : i32
    return %c0_i32, %c0_i32_0 : i32, i32
  }
  func.func @transform_6(%arg0: i32) -> (i32, i32, i32) {
    %c0_i32 = arith.constant 0 : i32
    %c0_i32_0 = arith.constant 0 : i32
    %c0_i32_1 = arith.constant 0 : i32
    %c0_i32_2 = arith.constant 0 : i32
    return %c0_i32, %c0_i32_0, %c0_i32_1 : i32, i32, i32
  }
  func.func @transform_7(%arg0: i32) -> (i32, i32) {
    %c0_i32 = arith.constant 0 : i32
    %c0_i32_0 = arith.constant 0 : i32
    %c0_i32_1 = arith.constant 0 : i32
    return %c0_i32, %c0_i32_0 : i32, i32
  }
  func.func @transform_8(%arg0: i32) -> (i32, i32) {
    %c0_i32 = arith.constant 0 : i32
    %c0_i32_0 = arith.constant 0 : i32
    %c0_i32_1 = arith.constant 0 : i32
    return %c0_i32, %c0_i32_0 : i32, i32
  }
  func.func @transform_9(%arg0: i32) -> (i32, i32) {
    %c0_i32 = arith.constant 0 : i32
    %c0_i32_0 = arith.constant 0 : i32
    %c0_i32_1 = arith.constant 0 : i32
    return %c0_i32, %c0_i32_0 : i32, i32
  }
  func.func @transform_10(%arg0: i32) -> (i32, i32) {
    %c0_i32 = arith.constant 0 : i32
    %c0_i32_0 = arith.constant 0 : i32
    %c0_i32_1 = arith.constant 0 : i32
    return %c0_i32, %c0_i32_0 : i32, i32
  }
  func.func @transform_11(%arg0: i32) -> (i32, i32) {
    %c0_i32 = arith.constant 0 : i32
    %c0_i32_0 = arith.constant 0 : i32
    %c0_i32_1 = arith.constant 0 : i32
    return %c0_i32, %c0_i32_0 : i32, i32
  }
  func.func @transform_12(%arg0: i32) -> (i32, i32) {
    %c0_i32 = arith.constant 0 : i32
    %c0_i32_0 = arith.constant 0 : i32
    %c0_i32_1 = arith.constant 0 : i32
    return %c0_i32, %c0_i32_0 : i32, i32
  }
  func.func @transform_13(%arg0: i32) -> (i32, i32) {
    %c0_i32 = arith.constant 0 : i32
    %c0_i32_0 = arith.constant 0 : i32
    %c0_i32_1 = arith.constant 0 : i32
    return %c0_i32, %c0_i32_0 : i32, i32
  }
  func.func @transform_14(%arg0: i32) -> (i32, i32) {
    %c0_i32 = arith.constant 0 : i32
    %c0_i32_0 = arith.constant 0 : i32
    return %arg0, %c0_i32 : i32, i32
  }
}

</mosaic_0001>

<bundles_post_ra>
// kernel: tile.9
= control target key start
LH: loop header
LB: loop body
LE: loop exit
PB: predicated region body
PF: predicated region fallthrough
CT: control target
= control target key end

     0   :  { %vm47_vm0 = vcmask 1047556   ;;  %vm49_vm1 = vcmask 523264   ;;  %vm64_vm2 = vcmask 1048064   ;;  %s141_s0 = inlined_call_operand.vmem [shape: f32[9,2,64], index: 0, kind: input, shape index: {}]   ;;  %s142_s1 = inlined_call_operand.vmem [shape: f32[9,128], index: 1, kind: output, shape index: {}]  }
   0x1   :  { %v81_v0 = vld [vmem:[%s141_s0 + $0xe] sm:$0x3]  ;;  %v82_v1 = vld [vmem:[%s141_s0 + $0xc] sm:$0x3]  ;;  %v83_v2 = vld [vmem:[%s141_s0 + $0xa] sm:$0x3] }
   0x2   :  { %13 = vst [vmem:[#allocation0 + $0x38] sm:$0x3] %v81_v0  ;;  %18 = vst [vmem:[#allocation0 + $0x30] sm:$0x3] %v82_v1  ;;  %v84_v3 = vld [vmem:[%s141_s0 + $0x8] sm:$0x3] }
   0x3   :  { %23 = vst [vmem:[#allocation0 + $0x28] sm:$0x3] %v83_v2  ;;  %v85_v4 = vld [vmem:[%s141_s0 + $0x6] sm:$0x3]  ;;  %v86_v5 = vld [vmem:[%s141_s0 + $0x4] sm:$0x3] }
   0x4   :  { %28 = vst [vmem:[#allocation0 + $0x20] sm:$0x3] %v84_v3  ;;  %33 = vst [vmem:[#allocation0 + $0x18] sm:$0x3] %v85_v4  ;;  %v87_v6 = vld [vmem:[%s141_s0 + $0x2] sm:$0x3] }
   0x5   :  { %38 = vst [vmem:[#allocation0 + $0x10] sm:$0x3] %v86_v5  ;;  %v43_v7 = vld [vmem:[%s141_s0] sm:$0x3]  ;;  %42 = vst [vmem:[#allocation0 + $0x8] sm:$0x3] %v87_v6 }
   0x6   :  { %44 = vst [vmem:[#allocation0] sm:$0x3] %v43_v7  ;;  %v80_v8 = vld [vmem:[%s141_s0 + $0x10] sm:$0x3]  ;;  %s91_s0 = smov 64  }
   0x7   :  { %8 = vst [vmem:[#allocation0 + $0x40] sm:$0x3] %v80_v8 }
   0xb   :  { %v59_v9 = vld [vmem:[#allocation0 + $0x1] ss:$8 sm:$0xf0]   ;;  %v46_v10 = vld [vmem:[#allocation0] ss:$8 sm:$0xf0]  }
   0xd   :  { %v45_v11 = vld [vmem:[#allocation0] ss:$8 sm:$0xf]   ;;  %v57_v12 = vld [vmem:[#allocation0 + $0x1] ss:$8 sm:$0xf]  }
   0xe   :  { %v61_v13 = vsel %vm47_vm0, %v59_v9, %v57_v12  ;;  %v48_v14 = vsel %vm47_vm0, %v46_v10, %v45_v11  ;;  %v52_v15 = vld [vmem:[#allocation0 + $0x40] sm:$0x1]   ;;  %v67_v16 = vld [vmem:[#allocation0 + $0x41] sm:$0x1]  }
   0xf   :  { %62 = vrot.lane.b32.xlu0 %v61_v13, %s91_s0  ;;  %50 = vst.msk [vmem:[%s142_s1] sm:$0xff] %vm49_vm1, %v48_v14   ;;  %88 = vst.msk [vmem:[%s142_s1 + $0x8] sm:$0x1] %vm49_vm1, %v52_v15  }
  0x13   :  { %68 = vrot.lane.b32.xlu0 %v67_v16, %s91_s0 }
  0x81   :  { %v63_v17 = vpop.permute.xlu0 %62  }
  0x82   :  { %65 = vst.msk [vmem:[%s142_s1] sm:$0xff] %vm64_vm2, %v63_v17  }
  0x85   :  { %v69_v18 = vpop.permute.xlu0 %68  }
  0x86   :  { %89 = vst.msk [vmem:[%s142_s1 + $0x8] sm:$0x1] %vm64_vm2, %v69_v18  }

// kernel: deeper_net_forward.1
= control target key start
LH: loop header
LB: loop body
LE: loop exit
PB: predicated region body
PF: predicated region fallthrough
CT: control target
= control target key end

     0   :  { %vm72_vm0 = vcmask 31744   ;;  %s5251_s15 = smov 8   ;;  %s5252_s16 = smov 7   ;;  %v5259_v2 = vmov 0   ;;  %vm79_vm1 = vcmask 1043456   ;;  %vm964_vm2 = vcmask 130048   ;;  %s6339_s0 = inlined_call_operand.vmem [shape: f32[4,128], index: 0, kind: input, shape index: {}]   ;;  %s6340_s2 = inlined_call_operand.vmem [shape: f32[9,16,4], index: 2, kind: input, shape index: {}]   ;;  %s6341_s3 = inlined_call_operand.vmem [shape: f32[16,1], index: 3, kind: input, shape index: {}]   ;;  %s6342_s1 = inlined_call_operand.vmem [shape: f32[9,128], index: 1, kind: input, shape index: {}]   ;;  %s6343_s4 = inlined_call_operand.vmem [shape: f32[9,64,16], index: 4, kind: input, shape index: {}]   ;;  %s6344_s5 = inlined_call_operand.vmem [shape: f32[64,1], index: 5, kind: input, shape index: {}]   ;;  %s6345_s6 = inlined_call_operand.vmem [shape: bf16[9,64,64], index: 6, kind: input, shape index: {}]   ;;  %s6346_s7 = inlined_call_operand.vmem [shape: f32[64,1], index: 7, kind: input, shape index: {}]   ;;  %s6347_s9 = inlined_call_operand.vmem [shape: f32[4,1], index: 9, kind: input, shape index: {}]   ;;  %s6348_s8 = inlined_call_operand.vmem [shape: bf16[4,64], index: 8, kind: input, shape index: {}]   ;;  %s6349_s10 = inlined_call_operand.vmem [shape: bf16[256,192], index: 10, kind: input, shape index: {}]   ;;  %s6350_s11 = inlined_call_operand.vmem [shape: f32[1,192], index: 11, kind: input, shape index: {}]   ;;  %s6351_s12 = inlined_call_operand.vmem [shape: f32[1,64], index: 12, kind: input, shape index: {}]   ;;  %s6352_s13 = inlined_call_operand.<no memory space> [shape: f32[1,1], index: 13, kind: input, shape index: {}]   ;;  %s6353_s14 = inlined_call_operand.vmem [shape: f32[2,128], index: 14, kind: output, shape index: {}]  }
   0x1   :  { %v50_v0 = vld [vmem:[%s6339_s0] sm:$0xf]  ;;  %v4061_v1 = vld [vmem:[%s6340_s2 + $0x10] sm:$0xff]  ;;  %s5253_s19 = smov 9   ;;  %s5254_s20 = smov 1   ;;  %5153 = vset.pattern.permute.xlu1 %v5259_v2  ;;  %5152 = vset.pattern.permute.xlu0 %v5259_v2  ;;  %v920_v3 = vld [vmem:[%s6341_s3 + $0x8] sm:$0xff] }
   0x2   :  { %61 = vrot.lane.b32.xlu0 %v50_v0, %s5251_s15  ;;  %242 = vrot.lane.b32.xlu1 %v50_v0, %s5252_s16  ;;  %s5255_s21 = smov 127   ;;  %s5256_s0 = smov 121   ;;  %v919_v4 = vld [vmem:[%s6341_s3] sm:$0xff]  ;;  %v4062_v9 = vld [vmem:[%s6340_s2 + $0x18] sm:$0xff]  ;;  %vm2440_vm3 = vcmask 523264   ;;  %vm5261_vm4 = vmmov 0  }
   0x3   :  { %4616 = vmatprep.mubr.msk.f32.mxu0 %vm72_vm0, %v4061_v1  ;;  %s5257_s22 = smov 120   ;;  %s5258_s23 = smov 119   ;;  %v5363_v5 = vld [vmem:[%s6342_s1 + $0x1] ss:$0 sm:$0xff]  ;;  %v5369_v8 = vld [vmem:[%s6342_s1] ss:$0 sm:$0xff] }
   0x4   :  { %v5377_v10 = vld [vmem:[%s6342_s1 + $0x2] ss:$0 sm:$0xff]  ;;  %v5393_v16 = vld [vmem:[%s6342_s1 + $0x3] ss:$0 sm:$0xff]  ;;  %v60_v18 = vld [vmem:[%s6340_s2 + $0x8] sm:$0xff]  ;;  %vm3712_vm5 = vcmask 516096  }
   0x5   :  { %v59_v12 = vld [vmem:[%s6340_s2] sm:$0xff]  ;;  %v4071_v22 = vld [vmem:[%s6340_s2 + $0x28] sm:$0xff]  ;;  %v4076_v23 = vld [vmem:[%s6340_s2 + $0x30] sm:$0xff]  ;;  %vm3727_vm6 = vcmask 1040896   ;;  %vm4009_vm7 = vcmask 1041408   ;;  %vm4030_vm8 = vcmask 517120  }
   0x6   :  { %51 = vrot.lane.b32.xlu0 %v50_v0, %s5253_s19  ;;  %339 = vrot.lane.b32.xlu1 %v50_v0, %s5254_s20  ;;  %v4070_v20 = vld [vmem:[%s6340_s2 + $0x20] sm:$0xff]  ;;  %v4077_v27 = vld [vmem:[%s6340_s2 + $0x38] sm:$0xff] }
   0x7   :  { %v5410_v21 = vld [vmem:[%s6342_s1 + $0x4] ss:$0 sm:$0xff]  ;;  %v5426_v25 = vld [vmem:[%s6342_s1 + $0x5] ss:$0 sm:$0xff]  ;;  %v5442_v30 = vld [vmem:[%s6342_s1 + $0x6] ss:$0 sm:$0xff] }
   0x8   :  { %v441_v24 = vmul.f32 %v5410_v21, %v50_v0  ;;  %v4082_v29 = vld [vmem:[%s6340_s2 + $0x40] sm:$0xff]  ;;  %v4083_v32 = vld [vmem:[%s6340_s2 + $0x48] sm:$0xff]  ;;  %v4088_v34 = vld [vmem:[%s6340_s2 + $0x50] sm:$0xff] }
   0x9   :  { %v5458_v35 = vld [vmem:[%s6342_s1 + $0x7] ss:$0 sm:$0xff]  ;;  %v4089_v37 = vld [vmem:[%s6340_s2 + $0x58] sm:$0xff]  ;;  %v5474_v40 = vld [vmem:[%s6342_s1 + $0x8] ss:$0 sm:$0xff] }
   0xa   :  { %531 = vrot.lane.b32.xlu0 %v50_v0, %s5255_s21  ;;  %628 = vrot.lane.b32.xlu1 %v50_v0, %s5256_s0  ;;  %v4094_v39 = vld [vmem:[%s6340_s2 + $0x60] sm:$0xff]  ;;  %v4095_v42 = vld [vmem:[%s6340_s2 + $0x68] sm:$0xff] }
   0xb   :  { %v4100_v44 = vld [vmem:[%s6340_s2 + $0x70] sm:$0xff]  ;;  %v4101_v45 = vld [vmem:[%s6340_s2 + $0x78] sm:$0xff]  ;;  %v4106_v46 = vld [vmem:[%s6340_s2 + $0x80] sm:$0xff] }
   0xc   :  { %v4107_v47 = vld [vmem:[%s6340_s2 + $0x88] sm:$0xff]  ;;  %v941_v50 = vld [vmem:[%s6343_s4] sm:$0xff]  ;;  %v2286_v62 = vld [vmem:[%s6344_s5 + $0x18] sm:$0xff] }
   0xd   :  { %4679 = vmatprep.mubr.msk.f32.mxu1 %vm964_vm2, %v941_v50  ;;  %v2284_v60 = vld [vmem:[%s6344_s5 + $0x8] sm:$0xff]  ;;  %v2283_v61 = vld [vmem:[%s6344_s5] sm:$0xff]  ;;  %v2285_v63 = vld [vmem:[%s6344_s5 + $0x10] sm:$0xff] }
   0xe   :  { %725 = vrot.lane.b32.xlu0 %v50_v0, %s5257_s22  ;;  %822 = vrot.lane.b32.xlu1 %v50_v0, %s5258_s23  ;;  %v2288_v0 = vld [vmem:[%s6344_s5 + $0x28] sm:$0xff]  ;;  %v2287_v1 = vld [vmem:[%s6344_s5 + $0x20] sm:$0xff] }
   0xf   :  { %v2290_v2 = vld [vmem:[%s6344_s5 + $0x38] sm:$0xff]  ;;  %v4141_v50 = vld [vmem:[%s6343_s4 + $0xb0] sm:$0xff] }
  0x12   :  { %928 = vperm.xlu1 %5153, %v920_v3   ;;  %923 = vperm.xlu0 %5152, %v919_v4   ;;  %v2289_v3 = vld [vmem:[%s6344_s5 + $0x30] sm:$0xff]  ;;  %v4111_v4 = vld [vmem:[%s6343_s4 + $0x40] sm:$0xff] }
  0x74   :  { %v62_v6 = vpop.permute.xlu0 %61  ;;  %v243_v11 = vpop.permute.xlu1 %242 }
  0x75   :  { %v68_v7 = vmul.f32 %v5363_v5, %v62_v6  ;;  %v249_v15 = vmul.f32 %v5377_v10, %v243_v11 }
  0x77   :  { %4614 = vmatprep.subr.msk.mxu0 %vm79_vm1, %v68_v7 }
  0x78   :  { %4615 = vmatpush3.msk.msra.mxu0 %vm79_vm1, %v68_v7  ;;  %v52_v13 = vpop.permute.xlu0 %51  ;;  %v340_v17 = vpop.permute.xlu1 %339 }
  0x79   :  { %v58_v14 = vmul.f32 %v5369_v8, %v52_v13  ;;  %4617 = vmatmul.mubr.msk.f32.vlgmr.msra.gmra.mrb[0].mxu0 %vm72_vm0, %v4062_v9  ;;  %v346_v19 = vmul.f32 %v5393_v16, %v340_v17 }
  0x7a   :  { %4621 = vmatprep.mubr.msk.f32.mxu0 %vm72_vm0, %v59_v12 }
  0x7b   :  { %4619 = vmatprep.subr.msk.mxu0 %vm79_vm1, %v58_v14 }
  0x7c   :  { %4620 = vmatpush3.msk.msra.mxu0 %vm79_vm1, %v58_v14  ;;  %v532_v26 = vpop.permute.xlu0 %531  ;;  %v629_v31 = vpop.permute.xlu1 %628 }
  0x7d   :  { %4624 = vmatprep.subr.msk.mxu0 %vm79_vm1, %v249_v15  ;;  %v538_v28 = vmul.f32 %v5426_v25, %v532_v26  ;;  %v635_v33 = vmul.f32 %v5442_v30, %v629_v31  ;;  %v947_v31 = vld [vmem:[%s6343_s4 + $0x30] sm:$0xff] }
  0x80   :  { %v726_v36 = vpop.permute.xlu0 %725  ;;  %v823_v41 = vpop.permute.xlu1 %822 }
  0x81   :  { %4622 = vmatmul.mubr.msk.f32.vlgmr.msra.gmra.mrb[0].mxu0 %vm72_vm0, %v60_v18  ;;  %v732_v38 = vmul.f32 %v5458_v35, %v726_v36  ;;  %v829_v43 = vmul.f32 %v5474_v40, %v823_v41  ;;  %v942_v18 = vld [vmem:[%s6343_s4 + $0x8] sm:$0xff]  ;;  %v4135_v36 = vld [vmem:[%s6343_s4 + $0x80] sm:$0xff]  ;;  %v4137_v41 = vld [vmem:[%s6343_s4 + $0x90] sm:$0xff] }
  0x82   :  { %4625 = vmatpush3.msk.msra.mxu0 %vm79_vm1, %v249_v15  ;;  %4626 = vmatprep.mubr.msk.f32.mxu0 %vm72_vm0, %v4070_v20 }
  0x83   :  { %4629 = vmatprep.subr.msk.mxu0 %vm79_vm1, %v346_v19 }
  0x89   :  { %4627 = vmatmul.mubr.msk.f32.vlgmr.msra.gmra.mrb[0].mxu0 %vm72_vm0, %v4071_v22 }
  0x8a   :  { %4630 = vmatpush3.msk.msra.mxu0 %vm79_vm1, %v346_v19  ;;  %4631 = vmatprep.mubr.msk.f32.mxu0 %vm72_vm0, %v4076_v23 }
  0x8b   :  { %4634 = vmatprep.subr.msk.mxu0 %vm79_vm1, %v441_v24 }
  0x91   :  { %4632 = vmatmul.mubr.msk.f32.vlgmr.msra.gmra.mrb[0].mxu0 %vm72_vm0, %v4077_v27  ;;  %v929_v48 = vpop.permute.xlu1 %928  ;;  %v924_v49 = vpop.permute.xlu0 %923  ;;  %v945_v27 = vld [vmem:[%s6343_s4 + $0x20] sm:$0xff] }
  0x92   :  { %4635 = vmatpush3.msk.msra.mxu0 %vm79_vm1, %v441_v24  ;;  %4636 = vmatprep.mubr.msk.f32.mxu0 %vm72_vm0, %v4082_v29 }
  0x93   :  { %4639 = vmatprep.subr.msk.mxu0 %vm79_vm1, %v538_v28 }
  0x99   :  { %4637 = vmatmul.mubr.msk.f32.vlgmr.msra.gmra.mrb[0].mxu0 %vm72_vm0, %v4083_v32 }
  0x9a   :  { %4640 = vmatpush3.msk.msra.mxu0 %vm79_vm1, %v538_v28  ;;  %4641 = vmatprep.mubr.msk.f32.mxu0 %vm72_vm0, %v4088_v34 }
  0x9b   :  { %4644 = vmatprep.subr.msk.mxu0 %vm79_vm1, %v635_v33 }
  0xa1   :  { %4642 = vmatmul.mubr.msk.f32.vlgmr.msra.gmra.mrb[0].mxu0 %vm72_vm0, %v4089_v37 }
  0xa2   :  { %4645 = vmatpush3.msk.msra.mxu0 %vm79_vm1, %v635_v33  ;;  %4646 = vmatprep.mubr.msk.f32.mxu0 %vm72_vm0, %v4094_v39  ;;  %v948_v33 = vld [vmem:[%s6343_s4 + $0x38] sm:$0xff] }
  0xa3   :  { %4649 = vmatprep.subr.msk.mxu0 %vm79_vm1, %v732_v38 }
  0xa9   :  { %4647 = vmatmul.mubr.msk.f32.vlgmr.msra.gmra.mrb[0].mxu0 %vm72_vm0, %v4095_v42 }
  0xaa   :  { %4650 = vmatpush3.msk.msra.mxu0 %vm79_vm1, %v732_v38  ;;  %4651 = vmatprep.mubr.msk.f32.mxu0 %vm72_vm0, %v4100_v44  ;;  %v4136_v38 = vld [vmem:[%s6343_s4 + $0x88] sm:$0xff] }
  0xab   :  { %4654 = vmatprep.subr.msk.mxu0 %vm79_vm1, %v829_v43 }
  0xb1   :  { %4652 = vmatmul.mubr.msk.f32.vlgmr.msra.gmra.mrb[0].mxu0 %vm72_vm0, %v4101_v45  ;;  %v4138_v45 = vld [vmem:[%s6343_s4 + $0x98] sm:$0xff] }
  0xb2   :  { %4655 = vmatpush3.msk.msra.mxu0 %vm79_vm1, %v829_v43  ;;  %4656 = vmatprep.mubr.msk.f32.mxu0 %vm72_vm0, %v4106_v46 }
  0xb9   :  { %4657 = vmatmul.mubr.msk.f32.vlgmr.msra.gmra.mrb[0].mxu0 %vm72_vm0, %v4107_v47  ;;  %v4139_v47 = vld [vmem:[%s6343_s4 + $0xa0] sm:$0xff] }
  0xba   :  { %4663 = vmatprep.mubr.msk.f32.mxu0 %vm964_vm2, %v4111_v4  ;;  %v4167_v4 = vld [vmem:[%s6343_s4 + $0x100] sm:$0xff] }
 0x18c   :  { %v4658_v51 = vpop.f32.mrb[0].mxu0 }
 0x18d   :  { %v932_v52 = vadd.f32 %v4658_v51, %v929_v48  ;;  %v908_v53 = vpop.f32.mrb[1].mxu0  ;;  %v4140_v48 = vld [vmem:[%s6343_s4 + $0xa8] sm:$0xff]  ;;  %v4113_v51 = vld [vmem:[%s6343_s4 + $0x50] sm:$0xff] }
 0x18e   :  { %v931_v54 = vadd.f32 %v924_v49, %v908_v53  ;;  %v4112_v49 = vld [vmem:[%s6343_s4 + $0x48] sm:$0xff]  ;;  %v4114_v53 = vld [vmem:[%s6343_s4 + $0x58] sm:$0xff] }
 0x18f   :  { %v934_v55 = vmax.f32 %v932_v52, 0.0  ;;  %v4142_v52 = vld [vmem:[%s6343_s4 + $0xb8] sm:$0xff] }
 0x190   :  { %v933_v56 = vmax.f32 %v931_v54, 0.0  ;;  %v4151_v54 = vld [vmem:[%s6343_s4 + $0xc0] sm:$0xff] }
 0x191   :  { %937 = vrot.lane.b32.xlu0 %v934_v55, %s5253_s19  ;;  %v1528_v57 = vmul.f32 %v5410_v21, %v934_v55 }
 0x192   :  { %935 = vrot.lane.b32.xlu1 %v933_v56, %s5253_s19  ;;  %v1527_v58 = vmul.f32 %v5410_v21, %v933_v56  ;;  %v943_v21 = vld [vmem:[%s6343_s4 + $0x10] sm:$0xff] }
 0x194   :  { %v5508_v59 = vpack.c.bf16 %v1528_v57, %v1527_v58  ;;  %v4152_v58 = vld [vmem:[%s6343_s4 + $0xc8] sm:$0xff] }
 0x195   :  { %1225 = vrot.lane.b32.xlu0 %v934_v55, %s5252_s16 }
 0x196   :  { %1223 = vrot.lane.b32.xlu1 %v933_v56, %s5252_s16 }
 0x199   :  { %1377 = vrot.lane.b32.xlu0 %v934_v55, %s5254_s20 }
 0x19a   :  { %1375 = vrot.lane.b32.xlu1 %v933_v56, %s5254_s20 }
 0x19d   :  { %1677 = vrot.lane.b32.xlu0 %v934_v55, %s5255_s21 }
 0x19e   :  { %1675 = vrot.lane.b32.xlu1 %v933_v56, %s5255_s21 }
 0x1a1   :  { %1829 = vrot.lane.b32.xlu0 %v934_v55, %s5256_s0 }
 0x1a2   :  { %1827 = vrot.lane.b32.xlu1 %v933_v56, %s5256_s0 }
 0x1a5   :  { %1981 = vrot.lane.b32.xlu0 %v934_v55, %s5257_s22 }
 0x1a6   :  { %1979 = vrot.lane.b32.xlu1 %v933_v56, %s5257_s22 }
 0x1a9   :  { %951 = vrot.lane.b32.xlu0 %v934_v55, %s5251_s15 }
 0x1aa   :  { %949 = vrot.lane.b32.xlu1 %v933_v56, %s5251_s15 }
 0x1ad   :  { %2133 = vrot.lane.b32.xlu0 %v934_v55, %s5258_s23  ;;  %v4115_v55 = vld [vmem:[%s6343_s4 + $0x60] sm:$0xff] }
 0x1ae   :  { %2131 = vrot.lane.b32.xlu1 %v933_v56, %s5258_s23 }
 0x1b1   :  { %2298 = vperm.xlu0 %5152, %v2284_v60   ;;  %v4116_v60 = vld [vmem:[%s6343_s4 + $0x68] sm:$0xff] }
 0x1b2   :  { %2293 = vperm.xlu1 %5153, %v2283_v61   ;;  %v4117_v61 = vld [vmem:[%s6343_s4 + $0x70] sm:$0xff] }
 0x1b5   :  { %2308 = vperm.xlu0 %5152, %v2286_v62  }
 0x1b6   :  { %2303 = vperm.xlu1 %5153, %v2285_v63   ;;  %v4154_v63 = vld [vmem:[%s6343_s4 + $0xd8] sm:$0xff] }
 0x1b9   :  { %2318 = vperm.xlu0 %5152, %v2288_v0   ;;  %v4118_v0 = vld [vmem:[%s6343_s4 + $0x78] sm:$0xff] }
 0x1ba   :  { %2313 = vperm.xlu1 %5153, %v2287_v1   ;;  %v4155_v1 = vld [vmem:[%s6343_s4 + $0xe0] sm:$0xff] }
 0x1bd   :  { %2328 = vperm.xlu0 %5152, %v2290_v2   ;;  %v4157_v2 = vld [vmem:[%s6343_s4 + $0xf0] sm:$0xff] }
 0x1be   :  { %2323 = vperm.xlu1 %5153, %v2289_v3   ;;  %v4158_v3 = vld [vmem:[%s6343_s4 + $0xf8] sm:$0xff] }
 0x203   :  { %v938_v6 = vpop.permute.xlu0 %937 }
 0x204   :  { %v940_v7 = vmul.f32 %v5369_v8, %v938_v6  ;;  %v936_v9 = vpop.permute.xlu1 %935 }
 0x205   :  { %v939_v11 = vmul.f32 %v5369_v8, %v936_v9  ;;  %v4168_v9 = vld [vmem:[%s6343_s4 + $0x108] sm:$0xff] }
 0x207   :  { %v1226_v12 = vpop.permute.xlu0 %1225  ;;  %v4963_v13 = vpack.c.bf16 %v940_v7, %v939_v11  ;;  %v4169_v11 = vld [vmem:[%s6343_s4 + $0x110] sm:$0xff] }
 0x208   :  { %v1228_v14 = vmul.f32 %v5377_v10, %v1226_v12  ;;  %v1224_v15 = vpop.permute.xlu1 %1223 }
 0x209   :  { %v1227_v17 = vmul.f32 %v5377_v10, %v1224_v15  ;;  %4964 = vmatprep.subr.bf16.mxu1 %v4963_v13  ;;  %v944_v10 = vld [vmem:[%s6343_s4 + $0x18] sm:$0xff]  ;;  %v4173_v15 = vld [vmem:[%s6343_s4 + $0x130] sm:$0xff] }
 0x20a   :  { %4966 = vmatpush3.bf16.msra.mxu1 %v4963_v13  ;;  %v4171_v13 = vld [vmem:[%s6343_s4 + $0x120] sm:$0xff] }
 0x20b   :  { %v4967_v19 = vpack.c.bf16 %v1228_v14, %v1227_v17  ;;  %v1378_v20 = vpop.permute.xlu0 %1377  ;;  %v4172_v14 = vld [vmem:[%s6343_s4 + $0x128] sm:$0xff]  ;;  %v4174_v17 = vld [vmem:[%s6343_s4 + $0x138] sm:$0xff] }
 0x20c   :  { %v1380_v8 = vmul.f32 %v5393_v16, %v1378_v20  ;;  %v1376_v22 = vpop.permute.xlu1 %1375 }
 0x20d   :  { %v1379_v23 = vmul.f32 %v5393_v16, %v1376_v22  ;;  %4680 = vmatmul.mubr.msk.f32.vlgmr.msra.gmra.mrb[0].mxu1 %vm964_vm2, %v942_v18  ;;  %4968 = vmatprep.subr.bf16.mxu1 %v4967_v19  ;;  %v946_v16 = vld [vmem:[%s6343_s4 + $0x28] sm:$0xff]  ;;  %v4183_v18 = vld [vmem:[%s6343_s4 + $0x140] sm:$0xff] }
 0x20e   :  { %4970 = vmatpush3.bf16.msra.mxu1 %v4967_v19  ;;  %4682 = vmatprep.mubr.msk.f32.mxu1 %vm964_vm2, %v943_v21  ;;  %v4184_v21 = vld [vmem:[%s6343_s4 + $0x148] sm:$0xff] }
 0x20f   :  { %v4971_v24 = vpack.c.bf16 %v1380_v8, %v1379_v23  ;;  %v1678_v26 = vpop.permute.xlu0 %1677  ;;  %v4185_v8 = vld [vmem:[%s6343_s4 + $0x150] sm:$0xff]  ;;  %v4187_v23 = vld [vmem:[%s6343_s4 + $0x160] sm:$0xff] }
 0x210   :  { %v1676_v28 = vpop.permute.xlu1 %1675  ;;  %v1680_v56 = vmul.f32 %v5426_v25, %v1678_v26 }
 0x211   :  { %4683 = vmatmul.mubr.msk.f32.gmra.mrb[2].mxu1 %vm964_vm2, %v944_v10  ;;  %4972 = vmatprep.subr.bf16.mxu1 %v4971_v24  ;;  %v1679_v57 = vmul.f32 %v5426_v25, %v1676_v28  ;;  %v4153_v25 = vld [vmem:[%s6343_s4 + $0xd0] sm:$0xff]  ;;  %v4188_v10 = vld [vmem:[%s6343_s4 + $0x168] sm:$0xff]  ;;  %v4190_v28 = vld [vmem:[%s6343_s4 + $0x178] sm:$0xff] }
 0x212   :  { %4685 = vmatprep.mubr.msk.f32.mxu1 %vm964_vm2, %v945_v27 }
 0x213   :  { %v5577_v29 = vpop.permute.xlu0 %1829  ;;  %v4979_v62 = vpack.c.bf16 %v1680_v56, %v1679_v57  ;;  %v4238_v56 = vld [vmem:[%s6343_s4 + $0x238] sm:$0xff] }
 0x214   :  { %v5582_v32 = vpop.permute.xlu1 %1827  ;;  %v1832_v6 = vmul.f32 %v5442_v30, %v5577_v29 }
 0x215   :  { %4686 = vmatmul.mubr.msk.f32.gmra.mrb[4].mxu1 %vm964_vm2, %v946_v16  ;;  %v1831_v7 = vmul.f32 %v5442_v30, %v5582_v32  ;;  %v4170_v30 = vld [vmem:[%s6343_s4 + $0x118] sm:$0xff]  ;;  %v4199_v16 = vld [vmem:[%s6343_s4 + $0x180] sm:$0xff]  ;;  %v4200_v32 = vld [vmem:[%s6343_s4 + $0x188] sm:$0xff] }
 0x216   :  { %4688 = vmatprep.mubr.msk.f32.mxu1 %vm964_vm2, %v947_v31 }
 0x217   :  { %v5589_v34 = vpop.permute.xlu0 %1981  ;;  %v4983_v12 = vpack.c.bf16 %v1832_v6, %v1831_v7 }
 0x218   :  { %v5594_v37 = vpop.permute.xlu1 %1979  ;;  %v1984_v19 = vmul.f32 %v5458_v35, %v5589_v34 }
 0x219   :  { %4689 = vmatmul.mubr.msk.f32.gmra.mrb[6].mxu1 %vm964_vm2, %v948_v33  ;;  %v1983_v20 = vmul.f32 %v5458_v35, %v5594_v37  ;;  %v4186_v35 = vld [vmem:[%s6343_s4 + $0x158] sm:$0xff]  ;;  %v4201_v33 = vld [vmem:[%s6343_s4 + $0x190] sm:$0xff]  ;;  %v4204_v37 = vld [vmem:[%s6343_s4 + $0x1a8] sm:$0xff] }
 0x21a   :  { %4695 = vmatprep.mubr.msk.f32.mxu1 %vm964_vm2, %v4135_v36  ;;  %v4203_v36 = vld [vmem:[%s6343_s4 + $0x1a0] sm:$0xff] }
 0x21b   :  { %v952_v39 = vpop.permute.xlu0 %951  ;;  %v4987_v22 = vpack.c.bf16 %v1984_v19, %v1983_v20 }
 0x21c   :  { %v954_v42 = vmul.f32 %v5363_v5, %v952_v39  ;;  %v950_v43 = vpop.permute.xlu1 %949  ;;  %v4206_v39 = vld [vmem:[%s6343_s4 + $0x1b8] sm:$0xff] }
 0x21d   :  { %v953_v44 = vmul.f32 %v5363_v5, %v950_v43  ;;  %4696 = vmatmul.mubr.msk.f32.vlgmr.msra.gmra.mrb[0].mxu1 %vm964_vm2, %v4136_v38  ;;  %v4205_v38 = vld [vmem:[%s6343_s4 + $0x1b0] sm:$0xff] }
 0x21e   :  { %4974 = vmatpush3.bf16.msra.mxu1 %v4971_v24  ;;  %4698 = vmatprep.mubr.msk.f32.mxu1 %vm964_vm2, %v4137_v41  ;;  %v4189_v24 = vld [vmem:[%s6343_s4 + $0x170] sm:$0xff]  ;;  %v4215_v41 = vld [vmem:[%s6343_s4 + $0x1c0] sm:$0xff] }
 0x21f   :  { %v4959_v46 = vpack.c.bf16 %v954_v42, %v953_v44  ;;  %4976 = vmatprep.subr.bf16.mxu1 %v5508_v59  ;;  %v2134_v26 = vpop.permute.xlu0 %2133  ;;  %v4216_v42 = vld [vmem:[%s6343_s4 + $0x1c8] sm:$0xff]  ;;  %v4217_v43 = vld [vmem:[%s6343_s4 + $0x1d0] sm:$0xff]  ;;  %v4218_v44 = vld [vmem:[%s6343_s4 + $0x1d8] sm:$0xff] }
 0x220   :  { %v2132_v27 = vpop.permute.xlu1 %2131  ;;  %v2136_v29 = vmul.f32 %v5474_v40, %v2134_v26 }
 0x221   :  { %4960 = vmatprep.subr.bf16.mxu0 %v4959_v46  ;;  %4699 = vmatmul.mubr.msk.f32.gmra.mrb[2].mxu1 %vm964_vm2, %v4138_v45  ;;  %v2135_v31 = vmul.f32 %v5474_v40, %v2132_v27  ;;  %v4202_v40 = vld [vmem:[%s6343_s4 + $0x198] sm:$0xff]  ;;  %v4219_v45 = vld [vmem:[%s6343_s4 + $0x1e0] sm:$0xff] }
 0x222   :  { %4962 = vmatpush3.bf16.msra.mxu0 %v4959_v46  ;;  %4701 = vmatprep.mubr.msk.f32.mxu1 %vm964_vm2, %v4139_v47  ;;  %v4220_v46 = vld [vmem:[%s6343_s4 + $0x1e8] sm:$0xff]  ;;  %v4221_v47 = vld [vmem:[%s6343_s4 + $0x1f0] sm:$0xff] }
 0x223   :  { %v4991_v34 = vpack.c.bf16 %v2136_v29, %v2135_v31 }
 0x225   :  { %4702 = vmatmul.mubr.msk.f32.gmra.mrb[4].mxu1 %vm964_vm2, %v4140_v48  ;;  %4664 = vmatmul.mubr.msk.f32.vlgmr.msra.gmra.mrb[2].mxu0 %vm964_vm2, %v4112_v49  ;;  %v4222_v48 = vld [vmem:[%s6343_s4 + $0x1f8] sm:$0xff]  ;;  %v4231_v49 = vld [vmem:[%s6343_s4 + $0x200] sm:$0xff] }
 0x226   :  { %4704 = vmatprep.mubr.msk.f32.mxu1 %vm964_vm2, %v4141_v50  ;;  %4666 = vmatprep.mubr.msk.f32.mxu0 %vm964_vm2, %v4113_v51  ;;  %v4232_v50 = vld [vmem:[%s6343_s4 + $0x208] sm:$0xff]  ;;  %v4233_v51 = vld [vmem:[%s6343_s4 + $0x210] sm:$0xff] }
 0x229   :  { %4705 = vmatmul.mubr.msk.f32.gmra.mrb[6].mxu1 %vm964_vm2, %v4142_v52  ;;  %4667 = vmatmul.mubr.msk.f32.gmra.mrb[4].mxu0 %vm964_vm2, %v4114_v53  ;;  %v4234_v52 = vld [vmem:[%s6343_s4 + $0x218] sm:$0xff]  ;;  %v4235_v53 = vld [vmem:[%s6343_s4 + $0x220] sm:$0xff] }
 0x22a   :  { %4711 = vmatprep.mubr.msk.f32.mxu1 %vm964_vm2, %v4151_v54  ;;  %4669 = vmatprep.mubr.msk.f32.mxu0 %vm964_vm2, %v4115_v55  ;;  %v4236_v54 = vld [vmem:[%s6343_s4 + $0x228] sm:$0xff]  ;;  %v4237_v55 = vld [vmem:[%s6343_s4 + $0x230] sm:$0xff] }
 0x22d   :  { %4712 = vmatmul.mubr.msk.f32.vlgmr.msra.gmra.mrb[0].mxu1 %vm964_vm2, %v4152_v58  ;;  %4670 = vmatmul.mubr.msk.f32.gmra.mrb[6].mxu0 %vm964_vm2, %v4116_v60 }
 0x22e   :  { %4978 = vmatpush3.bf16.msra.mxu1 %v5508_v59  ;;  %4714 = vmatprep.mubr.msk.f32.mxu1 %vm964_vm2, %v4153_v25  ;;  %v4156_v59 = vld [vmem:[%s6343_s4 + $0xe8] sm:$0xff] }
 0x22f   :  { %4980 = vmatprep.subr.bf16.mxu1 %v4979_v62  ;;  %4672 = vmatprep.mubr.msk.f32.mxu0 %vm964_vm2, %v4117_v61 }
 0x231   :  { %4715 = vmatmul.mubr.msk.f32.gmra.mrb[2].mxu1 %vm964_vm2, %v4154_v63  ;;  %4673 = vmatmul.mubr.msk.f32.gmra.mrb[8].mxu0 %vm964_vm2, %v4118_v0 }
 0x232   :  { %4717 = vmatprep.mubr.msk.f32.mxu1 %vm964_vm2, %v4155_v1  ;;  %v2299_v1 = vpop.permute.xlu0 %2298 }
 0x235   :  { %4718 = vmatmul.mubr.msk.f32.gmra.mrb[4].mxu1 %vm964_vm2, %v4156_v59  ;;  %v2294_v59 = vpop.permute.xlu1 %2293 }
 0x236   :  { %4720 = vmatprep.mubr.msk.f32.mxu1 %vm964_vm2, %v4157_v2  ;;  %v2309_v6 = vpop.permute.xlu0 %2308 }
 0x239   :  { %4721 = vmatmul.mubr.msk.f32.gmra.mrb[6].mxu1 %vm964_vm2, %v4158_v3 }
 0x23a   :  { %4727 = vmatprep.mubr.msk.f32.mxu1 %vm964_vm2, %v4167_v4  ;;  %v2319_v20 = vpop.permute.xlu0 %2318 }
 0x23d   :  { %4728 = vmatmul.mubr.msk.f32.vlgmr.msra.gmra.mrb[0].mxu1 %vm964_vm2, %v4168_v9  ;;  %v2304_v9 = vpop.permute.xlu1 %2303 }
 0x23e   :  { %4982 = vmatpush3.bf16.msra.mxu1 %v4979_v62  ;;  %4730 = vmatprep.mubr.msk.f32.mxu1 %vm964_vm2, %v4169_v11 }
 0x23f   :  { %4984 = vmatprep.subr.bf16.mxu1 %v4983_v12 }
 0x241   :  { %4731 = vmatmul.mubr.msk.f32.gmra.mrb[2].mxu1 %vm964_vm2, %v4170_v30 }
 0x242   :  { %4733 = vmatprep.mubr.msk.f32.mxu1 %vm964_vm2, %v4171_v13 }
 0x245   :  { %4734 = vmatmul.mubr.msk.f32.gmra.mrb[4].mxu1 %vm964_vm2, %v4172_v14 }
 0x246   :  { %4736 = vmatprep.mubr.msk.f32.mxu1 %vm964_vm2, %v4173_v15 }
 0x249   :  { %4737 = vmatmul.mubr.msk.f32.gmra.mrb[6].mxu1 %vm964_vm2, %v4174_v17 }
 0x24a   :  { %4743 = vmatprep.mubr.msk.f32.mxu1 %vm964_vm2, %v4183_v18 }
 0x24d   :  { %4744 = vmatmul.mubr.msk.f32.vlgmr.msra.gmra.mrb[0].mxu1 %vm964_vm2, %v4184_v21 }
 0x24e   :  { %4986 = vmatpush3.bf16.msra.mxu1 %v4983_v12  ;;  %4746 = vmatprep.mubr.msk.f32.mxu1 %vm964_vm2, %v4185_v8 }
 0x24f   :  { %4988 = vmatprep.subr.bf16.mxu1 %v4987_v22 }
 0x251   :  { %4747 = vmatmul.mubr.msk.f32.gmra.mrb[2].mxu1 %vm964_vm2, %v4186_v35 }
 0x252   :  { %4749 = vmatprep.mubr.msk.f32.mxu1 %vm964_vm2, %v4187_v23 }
 0x255   :  { %4750 = vmatmul.mubr.msk.f32.gmra.mrb[4].mxu1 %vm964_vm2, %v4188_v10 }
 0x256   :  { %4752 = vmatprep.mubr.msk.f32.mxu1 %vm964_vm2, %v4189_v24 }
 0x259   :  { %4753 = vmatmul.mubr.msk.f32.gmra.mrb[6].mxu1 %vm964_vm2, %v4190_v28 }
 0x25a   :  { %4759 = vmatprep.mubr.msk.f32.mxu1 %vm964_vm2, %v4199_v16 }
 0x25d   :  { %4760 = vmatmul.mubr.msk.f32.vlgmr.msra.gmra.mrb[0].mxu1 %vm964_vm2, %v4200_v32 }
 0x25e   :  { %4990 = vmatpush3.bf16.msra.mxu1 %v4987_v22  ;;  %4762 = vmatprep.mubr.msk.f32.mxu1 %vm964_vm2, %v4201_v33  ;;  %v2314_v22 = vpop.permute.xlu1 %2313  ;;  %v2329_v33 = vpop.permute.xlu0 %2328 }
 0x25f   :  { %4992 = vmatprep.subr.bf16.mxu1 %v4991_v34 }
 0x261   :  { %4763 = vmatmul.mubr.msk.f32.gmra.mrb[2].mxu1 %vm964_vm2, %v4202_v40 }
 0x262   :  { %4765 = vmatprep.mubr.msk.f32.mxu1 %vm964_vm2, %v4203_v36  ;;  %v5154_v36 = vld [vmem:[%s6345_s6 + $0x20] sm:$0xff]  }
 0x263   :  { %4811 = vmatprep.mubr.msk.bf16.mxu0 %vm2440_vm3, %v5154_v36 }
 0x265   :  { %4766 = vmatmul.mubr.msk.f32.gmra.mrb[4].mxu1 %vm964_vm2, %v4204_v37  ;;  %v2324_v37 = vpop.permute.xlu1 %2323 }
 0x266   :  { %4768 = vmatprep.mubr.msk.f32.mxu1 %vm964_vm2, %v4205_v38 }
 0x269   :  { %4769 = vmatmul.mubr.msk.f32.gmra.mrb[6].mxu1 %vm964_vm2, %v4206_v39 }
 0x26a   :  { %4775 = vmatprep.mubr.msk.f32.mxu1 %vm964_vm2, %v4215_v41 }
 0x26d   :  { %4776 = vmatmul.mubr.msk.f32.vlgmr.msra.gmra.mrb[0].mxu1 %vm964_vm2, %v4216_v42 }
 0x26e   :  { %4994 = vmatpush3.bf16.msra.mxu1 %v4991_v34  ;;  %4778 = vmatprep.mubr.msk.f32.mxu1 %vm964_vm2, %v4217_v43 }
 0x271   :  { %4779 = vmatmul.mubr.msk.f32.gmra.mrb[2].mxu1 %vm964_vm2, %v4218_v44 }
 0x272   :  { %4781 = vmatprep.mubr.msk.f32.mxu1 %vm964_vm2, %v4219_v45 }
 0x275   :  { %4782 = vmatmul.mubr.msk.f32.gmra.mrb[4].mxu1 %vm964_vm2, %v4220_v46  ;;  %v5242_v46 = vld [vmem:[%s6342_s1 + $0x1] ss:$0 sm:$0xff] }
 0x276   :  { %4784 = vmatprep.mubr.msk.f32.mxu1 %vm964_vm2, %v4221_v47 }
 0x279   :  { %4785 = vmatmul.mubr.msk.f32.gmra.mrb[6].mxu1 %vm964_vm2, %v4222_v48 }
 0x27a   :  { %4791 = vmatprep.mubr.msk.f32.mxu1 %vm964_vm2, %v4231_v49 }
 0x27d   :  { %4792 = vmatmul.mubr.msk.f32.vlgmr.msra.gmra.mrb[0].mxu1 %vm964_vm2, %v4232_v50 }
 0x27e   :  { %4794 = vmatprep.mubr.msk.f32.mxu1 %vm964_vm2, %v4233_v51 }
 0x281   :  { %4795 = vmatmul.mubr.msk.f32.gmra.mrb[2].mxu1 %vm964_vm2, %v4234_v52 }
 0x282   :  { %4797 = vmatprep.mubr.msk.f32.mxu1 %vm964_vm2, %v4235_v53 }
 0x285   :  { %4798 = vmatmul.mubr.msk.f32.gmra.mrb[4].mxu1 %vm964_vm2, %v4236_v54 }
 0x286   :  { %4800 = vmatprep.mubr.msk.f32.mxu1 %vm964_vm2, %v4237_v55 }
 0x289   :  { %4801 = vmatmul.mubr.msk.f32.gmra.mrb[6].mxu1 %vm964_vm2, %v4238_v56 }
 0x2f8   :  { %v4665_v57 = vpop.f32.mrb[2].mxu0 }
 0x2f9   :  { %v1055_v58 = vpop.f32.mrb[3].mxu0 }
 0x2fc   :  { %v4668_v60 = vpop.f32.mrb[4].mxu0 }
 0x2fd   :  { %v1065_v25 = vpop.f32.mrb[5].mxu0 }
 0x300   :  { %v4671_v61 = vpop.f32.mrb[6].mxu0 }
 0x301   :  { %v1075_v62 = vpop.f32.mrb[7].mxu0 }
 0x304   :  { %v4674_v63 = vpop.f32.mrb[8].mxu0 }
 0x305   :  { %v1085_v0 = vpop.f32.mrb[9].mxu0 }
 0x350   :  { %v4793_v2 = vpop.f32.mrb[0].mxu1 }
 0x351   :  { %v4995_v3 = vadd.f32 %v4793_v2, %v4665_v57  ;;  %v2236_v4 = vpop.f32.mrb[1].mxu1  ;;  %v3594_v57 = vld [vmem:[%s6346_s7 + $0x8] sm:$0xff]  ;;  %v3595_v2 = vld [vmem:[%s6346_s7 + $0x10] sm:$0xff] }
 0x352   :  { %v4996_v7 = vadd.f32 %v2236_v4, %v1055_v58 }
 0x353   :  { %v2332_v11 = vadd.f32 %v4995_v3, %v2299_v1  ;;  %v5243_v3 = vld [vmem:[%s6342_s1] ss:$0 sm:$0xff] }
 0x354   :  { %v2331_v12 = vadd.f32 %v4996_v7, %v2294_v59  ;;  %v4796_v30 = vpop.f32.mrb[2].mxu1 }
 0x355   :  { %v5862_v13 = vmax.f32 %v2332_v11, 0.0  ;;  %v4997_v14 = vadd.f32 %v4796_v30, %v4668_v60  ;;  %v2246_v15 = vpop.f32.mrb[3].mxu1  ;;  %v3598_v11 = vld [vmem:[%s6346_s7 + $0x28] sm:$0xff] }
 0x356   :  { %v5864_v17 = vmax.f32 %v2331_v12, 0.0  ;;  %v4998_v18 = vadd.f32 %v2246_v15, %v1065_v25  ;;  %v3593_v25 = vld [vmem:[%s6346_s7] sm:$0xff]  ;;  %v5156_v15 = vld [vmem:[%s6345_s6 + $0x30] sm:$0xff]  }
 0x357   :  { %v2334_v19 = vadd.f32 %v4997_v14, %v2309_v6  ;;  %2385 = vrot.lane.b32.xlu0 %v5862_v13, %s5251_s15  ;;  %v3597_v14 = vld [vmem:[%s6346_s7 + $0x20] sm:$0xff] }
 0x358   :  { %v2333_v21 = vadd.f32 %v4998_v18, %v2304_v9  ;;  %2383 = vrot.lane.b32.xlu1 %v5864_v17, %s5251_s15  ;;  %v4799_v8 = vpop.f32.mrb[4].mxu1  ;;  %v5155_v9 = vld [vmem:[%s6345_s6 + $0x28] sm:$0xff]  }
 0x359   :  { %v5870_v35 = vmax.f32 %v2334_v19, 0.0  ;;  %v4999_v23 = vadd.f32 %v4799_v8, %v4671_v61  ;;  %v2256_v10 = vpop.f32.mrb[5].mxu1 }
 0x35a   :  { %v5872_v24 = vmax.f32 %v2333_v21, 0.0  ;;  %v5000_v26 = vadd.f32 %v2256_v10, %v1075_v62  ;;  %v3600_v21 = vld [vmem:[%s6346_s7 + $0x38] sm:$0xff] }
 0x35b   :  { %v2336_v27 = vadd.f32 %v4999_v23, %v2319_v20  ;;  %2389 = vrot.lane.b32.xlu0 %v5870_v35, %s5251_s15  ;;  %v3599_v23 = vld [vmem:[%s6346_s7 + $0x30] sm:$0xff] }
 0x35c   :  { %v2335_v28 = vadd.f32 %v5000_v26, %v2314_v22  ;;  %2387 = vrot.lane.b32.xlu1 %v5872_v24, %s5251_s15  ;;  %v4802_v16 = vpop.f32.mrb[6].mxu1 }
 0x35d   :  { %v5878_v29 = vmax.f32 %v2336_v27, 0.0  ;;  %v5001_v31 = vadd.f32 %v4802_v16, %v4674_v63  ;;  %v2266_v32 = vpop.f32.mrb[7].mxu1  ;;  %v5158_v16 = vld [vmem:[%s6345_s6] sm:$0xff]  }
 0x35e   :  { %v5880_v34 = vmax.f32 %v2335_v28, 0.0  ;;  %v5002_v40 = vadd.f32 %v2266_v32, %v1085_v0  ;;  %v3596_v0 = vld [vmem:[%s6346_s7 + $0x18] sm:$0xff] }
 0x35f   :  { %v2338_v38 = vadd.f32 %v5001_v31, %v2329_v33  ;;  %2393 = vrot.lane.b32.xlu0 %v5878_v29, %s5251_s15  ;;  %v5157_v28 = vld [vmem:[%s6345_s6 + $0x38] sm:$0xff]   ;;  %v3662_v33 = vld [vmem:[%s6347_s9] sm:$0xf] }
 0x360   :  { %v2337_v39 = vadd.f32 %v5002_v40, %v2324_v37  ;;  %2391 = vrot.lane.b32.xlu1 %v5880_v34, %s5251_s15 }
 0x361   :  { %v5890_v41 = vmax.f32 %v2338_v38, 0.0 }
 0x362   :  { %v5892_v42 = vmax.f32 %v2337_v39, 0.0 }
 0x363   :  { %2397 = vrot.lane.b32.xlu0 %v5890_v41, %s5251_s15 }
 0x364   :  { %2395 = vrot.lane.b32.xlu1 %v5892_v42, %s5251_s15 }
 0x367   :  { %2349 = vrot.lane.b32.xlu0 %v5862_v13, %s5253_s19 }
 0x368   :  { %2347 = vrot.lane.b32.xlu1 %v5864_v17, %s5253_s19 }
 0x36b   :  { %2353 = vrot.lane.b32.xlu0 %v5870_v35, %s5253_s19 }
 0x36c   :  { %2351 = vrot.lane.b32.xlu1 %v5872_v24, %s5253_s19 }
 0x36f   :  { %2357 = vrot.lane.b32.xlu0 %v5878_v29, %s5253_s19 }
 0x370   :  { %2355 = vrot.lane.b32.xlu1 %v5880_v34, %s5253_s19 }
 0x373   :  { %2361 = vrot.lane.b32.xlu0 %v5890_v41, %s5253_s19 }
 0x374   :  { %2359 = vrot.lane.b32.xlu1 %v5892_v42, %s5253_s19 }
 0x377   :  { %2617 = vrot.lane.b32.xlu0 %v5862_v13, %s5252_s16 }
 0x378   :  { %2615 = vrot.lane.b32.xlu1 %v5864_v17, %s5252_s16 }
 0x37b   :  { %2621 = vrot.lane.b32.xlu0 %v5870_v35, %s5252_s16 }
 0x37c   :  { %2619 = vrot.lane.b32.xlu1 %v5872_v24, %s5252_s16 }
 0x37f   :  { %2625 = vrot.lane.b32.xlu0 %v5878_v29, %s5252_s16 }
 0x380   :  { %2623 = vrot.lane.b32.xlu1 %v5880_v34, %s5252_s16 }
 0x383   :  { %2629 = vrot.lane.b32.xlu0 %v5890_v41, %s5252_s16 }
 0x384   :  { %2627 = vrot.lane.b32.xlu1 %v5892_v42, %s5252_s16 }
 0x387   :  { %2759 = vrot.lane.b32.xlu0 %v5862_v13, %s5254_s20 }
 0x388   :  { %2757 = vrot.lane.b32.xlu1 %v5864_v17, %s5254_s20 }
 0x38b   :  { %2763 = vrot.lane.b32.xlu0 %v5870_v35, %s5254_s20 }
 0x38c   :  { %2761 = vrot.lane.b32.xlu1 %v5872_v24, %s5254_s20 }
 0x38f   :  { %2767 = vrot.lane.b32.xlu0 %v5878_v29, %s5254_s20 }
 0x390   :  { %2765 = vrot.lane.b32.xlu1 %v5880_v34, %s5254_s20 }
 0x393   :  { %2771 = vrot.lane.b32.xlu0 %v5890_v41, %s5254_s20 }
 0x394   :  { %2769 = vrot.lane.b32.xlu1 %v5892_v42, %s5254_s20 }
 0x397   :  { %3027 = vrot.lane.b32.xlu0 %v5862_v13, %s5255_s21 }
 0x398   :  { %3025 = vrot.lane.b32.xlu1 %v5864_v17, %s5255_s21 }
 0x39b   :  { %3031 = vrot.lane.b32.xlu0 %v5870_v35, %s5255_s21 }
 0x39c   :  { %3029 = vrot.lane.b32.xlu1 %v5872_v24, %s5255_s21 }
 0x39f   :  { %3035 = vrot.lane.b32.xlu0 %v5878_v29, %s5255_s21 }
 0x3a0   :  { %3033 = vrot.lane.b32.xlu1 %v5880_v34, %s5255_s21 }
 0x3a3   :  { %3039 = vrot.lane.b32.xlu0 %v5890_v41, %s5255_s21 }
 0x3a4   :  { %3037 = vrot.lane.b32.xlu1 %v5892_v42, %s5255_s21  ;;  %s5263_s21 = smov 64  }
 0x3a7   :  { %3169 = vrot.lane.b32.xlu0 %v5862_v13, %s5256_s0 }
 0x3a8   :  { %3167 = vrot.lane.b32.xlu1 %v5864_v17, %s5256_s0 }
 0x3ab   :  { %3173 = vrot.lane.b32.xlu0 %v5870_v35, %s5256_s0 }
 0x3ac   :  { %3171 = vrot.lane.b32.xlu1 %v5872_v24, %s5256_s0 }
 0x3af   :  { %3177 = vrot.lane.b32.xlu0 %v5878_v29, %s5256_s0 }
 0x3b0   :  { %3175 = vrot.lane.b32.xlu1 %v5880_v34, %s5256_s0 }
 0x3b3   :  { %3181 = vrot.lane.b32.xlu0 %v5890_v41, %s5256_s0 }
 0x3b4   :  { %3179 = vrot.lane.b32.xlu1 %v5892_v42, %s5256_s0 }
 0x3b7   :  { %3311 = vrot.lane.b32.xlu0 %v5862_v13, %s5257_s22 }
 0x3b8   :  { %3309 = vrot.lane.b32.xlu1 %v5864_v17, %s5257_s22 }
 0x3bb   :  { %3315 = vrot.lane.b32.xlu0 %v5870_v35, %s5257_s22 }
 0x3bc   :  { %3313 = vrot.lane.b32.xlu1 %v5872_v24, %s5257_s22 }
 0x3bf   :  { %3319 = vrot.lane.b32.xlu0 %v5878_v29, %s5257_s22 }
 0x3c0   :  { %3317 = vrot.lane.b32.xlu1 %v5880_v34, %s5257_s22 }
 0x3c3   :  { %3323 = vrot.lane.b32.xlu0 %v5890_v41, %s5257_s22 }
 0x3c4   :  { %3321 = vrot.lane.b32.xlu1 %v5892_v42, %s5257_s22 }
 0x3c7   :  { %3453 = vrot.lane.b32.xlu0 %v5862_v13, %s5258_s23 }
 0x3c8   :  { %3451 = vrot.lane.b32.xlu1 %v5864_v17, %s5258_s23 }
 0x3c9   :  { %v2386_v43 = vpop.permute.xlu0 %2385 }
 0x3ca   :  { %v2400_v44 = vmul.f32 %v5363_v5, %v2386_v43  ;;  %v2384_v45 = vpop.permute.xlu1 %2383  ;;  %v5244_v43 = vld [vmem:[%s6342_s1 + $0x2] ss:$0 sm:$0xff] }
 0x3cb   :  { %v2399_v47 = vmul.f32 %v5242_v46, %v2384_v45  ;;  %3457 = vrot.lane.b32.xlu0 %v5870_v35, %s5258_s23 }
 0x3cc   :  { %3455 = vrot.lane.b32.xlu1 %v5872_v24, %s5258_s23 }
 0x3cd   :  { %v2407_v48 = vpack.c.bf16 %v2400_v44, %v2399_v47  ;;  %v2390_v49 = vpop.permute.xlu0 %2389  ;;  %v5159_v47 = vld [vmem:[%s6345_s6 + $0x8] sm:$0xff]  }
 0x3ce   :  { %v2402_v50 = vmul.f32 %v5242_v46, %v2390_v49  ;;  %v2388_v51 = vpop.permute.xlu1 %2387 }
 0x3cf   :  { %v2401_v52 = vmul.f32 %v5242_v46, %v2388_v51  ;;  %4803 = vmatprep.subr.bf16.mxu0 %v2407_v48  ;;  %3461 = vrot.lane.b32.xlu0 %v5878_v29, %s5258_s23 }
 0x3d0   :  { %4804 = vmatpush3.bf16.msra.mxu0 %v2407_v48  ;;  %3459 = vrot.lane.b32.xlu1 %v5880_v34, %s5258_s23 }
 0x3d1   :  { %v2408_v5 = vpack.c.bf16 %v2402_v50, %v2401_v52  ;;  %v2394_v53 = vpop.permute.xlu0 %2393  ;;  %v5160_v50 = vld [vmem:[%s6345_s6 + $0x10] sm:$0xff]  }
 0x3d2   :  { %v2404_v54 = vmul.f32 %v5242_v46, %v2394_v53  ;;  %v2392_v55 = vpop.permute.xlu1 %2391 }
 0x3d3   :  { %v2403_v56 = vmul.f32 %v5242_v46, %v2392_v55  ;;  %4805 = vmatprep.subr.bf16.mxu0 %v2408_v5  ;;  %3465 = vrot.lane.b32.xlu0 %v5890_v41, %s5258_s23 }
 0x3d4   :  { %4806 = vmatpush3.bf16.msra.mxu0 %v2408_v5  ;;  %3463 = vrot.lane.b32.xlu1 %v5892_v42, %s5258_s23 }
 0x3d5   :  { %v2409_v58 = vpack.c.bf16 %v2404_v54, %v2403_v56  ;;  %v2398_v60 = vpop.permute.xlu0 %2397 }
 0x3d6   :  { %v2406_v61 = vmul.f32 %v5242_v46, %v2398_v60  ;;  %v2396_v62 = vpop.permute.xlu1 %2395 }
 0x3d7   :  { %v2405_v63 = vmul.f32 %v5242_v46, %v2396_v62  ;;  %4807 = vmatprep.subr.bf16.mxu0 %v2409_v58  ;;  %3608 = vperm.xlu0 %5152, %v3594_v57  }
 0x3d8   :  { %4808 = vmatpush3.bf16.msra.mxu0 %v2409_v58  ;;  %3603 = vperm.xlu1 %5153, %v3593_v25   ;;  %v5161_v58 = vld [vmem:[%s6345_s6 + $0x18] sm:$0xff]  }
 0x3d9   :  { %v2410_v1 = vpack.c.bf16 %v2406_v61, %v2405_v63  ;;  %v2350_v59 = vpop.permute.xlu0 %2349  ;;  %v5162_v61 = vld [vmem:[%s6345_s6 + $0x40] sm:$0xff]  }
 0x3da   :  { %v2364_v4 = vmul.f32 %v5243_v3, %v2350_v59  ;;  %v2348_v6 = vpop.permute.xlu1 %2347 }
 0x3db   :  { %v2363_v7 = vmul.f32 %v5243_v3, %v2348_v6  ;;  %3618 = vperm.xlu0 %5152, %v3596_v0   ;;  %4809 = vmatprep.subr.bf16.mxu0 %v2410_v1 }
 0x3dc   :  { %3613 = vperm.xlu1 %5153, %v3595_v2   ;;  %4810 = vmatpush3.bf16.msra.mxu0 %v2410_v1  ;;  %v5245_v2 = vld [vmem:[%s6342_s1 + $0x3] ss:$0 sm:$0xff] }
 0x3dd   :  { %v2371_v12 = vpack.c.bf16 %v2364_v4, %v2363_v7  ;;  %v2354_v30 = vpop.permute.xlu0 %2353  ;;  %v5163_v7 = vld [vmem:[%s6345_s6 + $0x48] sm:$0xff]  }
 0x3de   :  { %v2366_v18 = vmul.f32 %v5243_v3, %v2354_v30  ;;  %v2352_v19 = vpop.permute.xlu1 %2351 }
 0x3df   :  { %v2365_v20 = vmul.f32 %v5243_v3, %v2352_v19  ;;  %3628 = vperm.xlu0 %5152, %v3598_v11   ;;  %4812 = vmatmul.mubr.msk.bf16.vlgmr.msra.gmra.mrb[12].mxu0 %vm2440_vm3, %v5155_v9 }
 0x3e0   :  { %4819 = vmatprep.subr.bf16.mxu0 %v2371_v12  ;;  %3623 = vperm.xlu1 %5153, %v3597_v14  }
 0x3e1   :  { %v2372_v8 = vpack.c.bf16 %v2366_v18, %v2365_v20  ;;  %4820 = vmatpush3.bf16.msra.mxu0 %v2371_v12  ;;  %v2358_v22 = vpop.permute.xlu0 %2357  ;;  %4815 = vmatprep.mubr.msk.bf16.mxu0 %vm2440_vm3, %v5156_v15  ;;  %v5164_v12 = vld [vmem:[%s6345_s6 + $0x50] sm:$0xff]  }
 0x3e2   :  { %v2368_v10 = vmul.f32 %v5243_v3, %v2358_v22  ;;  %v2356_v26 = vpop.permute.xlu1 %2355  ;;  %v5165_v22 = vld [vmem:[%s6345_s6 + $0x58] sm:$0xff]  }
 0x3e3   :  { %v2367_v27 = vmul.f32 %v5243_v3, %v2356_v26  ;;  %3638 = vperm.xlu0 %5152, %v3600_v21   ;;  %4821 = vmatprep.subr.bf16.mxu0 %v2372_v8  ;;  %v5166_v26 = vld [vmem:[%s6345_s6 + $0x60] sm:$0xff]  }
 0x3e4   :  { %3633 = vperm.xlu1 %5153, %v3599_v23  }
 0x3e5   :  { %v2373_v31 = vpack.c.bf16 %v2368_v10, %v2367_v27  ;;  %4822 = vmatpush3.bf16.msra.mxu0 %v2372_v8  ;;  %v2362_v32 = vpop.permute.xlu0 %2361 }
 0x3e6   :  { %v2370_v40 = vmul.f32 %v5243_v3, %v2362_v32  ;;  %v2360_v36 = vpop.permute.xlu1 %2359 }
 0x3e7   :  { %v2369_v37 = vmul.f32 %v5243_v3, %v2360_v36  ;;  %4816 = vmatmul.mubr.msk.bf16.gmra.mrb[16].mxu0 %vm2440_vm3, %v5157_v28  ;;  %4823 = vmatprep.subr.bf16.mxu0 %v2373_v31 }
 0x3e8   :  { %3665 = vperm.xlu1 %5153, %v3662_v33   ;;  %4827 = vmatprep.mubr.msk.bf16.mxu0 %vm2440_vm3, %v5158_v16 }
 0x3e9   :  { %v2374_v38 = vpack.c.bf16 %v2370_v40, %v2369_v37  ;;  %4824 = vmatpush3.bf16.msra.mxu0 %v2373_v31  ;;  %v2618_v39 = vpop.permute.xlu0 %2617  ;;  %v5246_v31 = vld [vmem:[%s6342_s1 + $0x4] ss:$0 sm:$0xff] }
 0x3ea   :  { %v2632_v44 = vmul.f32 %v5244_v43, %v2618_v39  ;;  %v2616_v45 = vpop.permute.xlu1 %2615  ;;  %v2899_v32 = vmul.f32 %v5246_v31, %v5864_v17  ;;  %v2900_v33 = vmul.f32 %v5246_v31, %v5862_v13  ;;  %v5167_v39 = vld [vmem:[%s6345_s6 + $0x68] sm:$0xff]   ;;  %v5168_v13 = vld [vmem:[%s6345_s6 + $0x70] sm:$0xff]  }
 0x3eb   :  { %v2631_v46 = vmul.f32 %v5244_v43, %v2616_v45  ;;  %4825 = vmatprep.subr.bf16.mxu0 %v2374_v38 }
 0x3ed   :  { %v2639_v48 = vpack.c.bf16 %v2632_v44, %v2631_v46  ;;  %4826 = vmatpush3.bf16.msra.mxu0 %v2374_v38  ;;  %v2622_v49 = vpop.permute.xlu0 %2621  ;;  %v2907_v38 = vpack.c.bf16 %v2900_v33, %v2899_v32  ;;  %v2902_v44 = vmul.f32 %v5246_v31, %v5870_v35 }
 0x3ee   :  { %v2634_v51 = vmul.f32 %v5244_v43, %v2622_v49  ;;  %v2620_v52 = vpop.permute.xlu1 %2619 }
 0x3ef   :  { %v2633_v5 = vmul.f32 %v5244_v43, %v2620_v52  ;;  %4835 = vmatprep.subr.bf16.mxu0 %v2639_v48  ;;  %v2906_v52 = vmul.f32 %v5246_v31, %v5890_v41 }
 0x3f0   :  { %4828 = vmatmul.mubr.msk.bf16.vlgmr.msra.gmra.mrb[12].mxu0 %vm2440_vm3, %v5159_v47  ;;  %v2903_v47 = vmul.f32 %v5246_v31, %v5880_v34 }
 0x3f1   :  { %v2640_v53 = vpack.c.bf16 %v2634_v51, %v2633_v5  ;;  %4836 = vmatpush3.bf16.msra.mxu0 %v2639_v48  ;;  %v2626_v54 = vpop.permute.xlu0 %2625  ;;  %4831 = vmatprep.mubr.msk.bf16.mxu0 %vm2440_vm3, %v5160_v50  ;;  %v2904_v48 = vmul.f32 %v5246_v31, %v5878_v29  ;;  %v5169_v50 = vld [vmem:[%s6345_s6 + $0x78] sm:$0xff]   ;;  %v2905_v51 = vmul.f32 %v5246_v31, %v5892_v42  ;;  %v5170_v29 = vld [vmem:[%s6345_s6 + $0x80] sm:$0xff]  }
 0x3f2   :  { %v2636_v55 = vmul.f32 %v5244_v43, %v2626_v54  ;;  %v2624_v56 = vpop.permute.xlu1 %2623 }
 0x3f3   :  { %v2635_v57 = vmul.f32 %v5244_v43, %v2624_v56  ;;  %4837 = vmatprep.subr.bf16.mxu0 %v2640_v53  ;;  %v2910_v56 = vpack.c.bf16 %v2906_v52, %v2905_v51 }
 0x3f5   :  { %v2641_v60 = vpack.c.bf16 %v2636_v55, %v2635_v57  ;;  %4838 = vmatpush3.bf16.msra.mxu0 %v2640_v53  ;;  %v2630_v25 = vpop.permute.xlu0 %2629  ;;  %v5247_v53 = vld [vmem:[%s6342_s1 + $0x5] ss:$0 sm:$0xff] }
 0x3f6   :  { %v2638_v62 = vmul.f32 %v5244_v43, %v2630_v25  ;;  %v2628_v63 = vpop.permute.xlu1 %2627  ;;  %v5171_v25 = vld [vmem:[%s6345_s6 + $0x88] sm:$0xff]  }
 0x3f7   :  { %v2637_v0 = vmul.f32 %v5244_v43, %v2628_v63  ;;  %4839 = vmatprep.subr.bf16.mxu0 %v2641_v60  ;;  %v2901_v43 = vmul.f32 %v5246_v31, %v5872_v24  ;;  %v2909_v24 = vpack.c.bf16 %v2904_v48, %v2903_v47 }
 0x3f8   :  { %4832 = vmatmul.mubr.msk.bf16.gmra.mrb[16].mxu0 %vm2440_vm3, %v5161_v58 }
 0x3f9   :  { %v2642_v1 = vpack.c.bf16 %v2638_v62, %v2637_v0  ;;  %4840 = vmatpush3.bf16.msra.mxu0 %v2641_v60  ;;  %v2760_v59 = vpop.permute.xlu0 %2759  ;;  %4843 = vmatprep.mubr.msk.bf16.mxu0 %vm2440_vm3, %v5162_v61  ;;  %v2908_v46 = vpack.c.bf16 %v2902_v44, %v2901_v43  ;;  %v5172_v62 = vld [vmem:[%s6345_s6 + $0x90] sm:$0xff]   ;;  %v5178_v43 = vld [vmem:[%s6345_s6 + $0xc0] sm:$0xff]  }
 0x3fa   :  { %v2774_v3 = vmul.f32 %v5245_v2, %v2760_v59  ;;  %v2758_v4 = vpop.permute.xlu1 %2757 }
 0x3fb   :  { %v2773_v6 = vmul.f32 %v5245_v2, %v2758_v4  ;;  %4841 = vmatprep.subr.bf16.mxu0 %v2642_v1 }
 0x3fd   :  { %v2781_v9 = vpack.c.bf16 %v2774_v3, %v2773_v6  ;;  %4842 = vmatpush3.bf16.msra.mxu0 %v2642_v1  ;;  %v2764_v11 = vpop.permute.xlu0 %2763 }
 0x3fe   :  { %v2776_v30 = vmul.f32 %v5245_v2, %v2764_v11  ;;  %v2762_v14 = vpop.permute.xlu1 %2761 }
 0x3ff   :  { %v2775_v15 = vmul.f32 %v5245_v2, %v2762_v14  ;;  %4851 = vmatprep.subr.bf16.mxu0 %v2781_v9 }
 0x400   :  { %4844 = vmatmul.mubr.msk.bf16.vlgmr.msra.gmra.mrb[12].mxu0 %vm2440_vm3, %v5163_v7 }
 0x401   :  { %v2782_v18 = vpack.c.bf16 %v2776_v30, %v2775_v15  ;;  %4852 = vmatpush3.bf16.msra.mxu0 %v2781_v9  ;;  %v2768_v19 = vpop.permute.xlu0 %2767  ;;  %4847 = vmatprep.mubr.msk.bf16.mxu0 %vm2440_vm3, %v5164_v12  ;;  %v5173_v9 = vld [vmem:[%s6345_s6 + $0x98] sm:$0xff]   ;;  %v5174_v12 = vld [vmem:[%s6345_s6 + $0xa0] sm:$0xff]  }
 0x402   :  { %v2778_v20 = vmul.f32 %v5245_v2, %v2768_v19  ;;  %v2766_v21 = vpop.permute.xlu1 %2765  ;;  %v5248_v15 = vld [vmem:[%s6342_s1 + $0x6] ss:$0 sm:$0xff] }
 0x403   :  { %v2777_v8 = vmul.f32 %v5245_v2, %v2766_v21  ;;  %4853 = vmatprep.subr.bf16.mxu0 %v2782_v18 }
 0x405   :  { %v2783_v23 = vpack.c.bf16 %v2778_v20, %v2777_v8  ;;  %4854 = vmatpush3.bf16.msra.mxu0 %v2782_v18  ;;  %v2772_v10 = vpop.permute.xlu0 %2771 }
 0x406   :  { %v2780_v27 = vmul.f32 %v5245_v2, %v2772_v10  ;;  %v2770_v28 = vpop.permute.xlu1 %2769  ;;  %v5175_v10 = vld [vmem:[%s6345_s6 + $0xa8] sm:$0xff]  }
 0x407   :  { %v2779_v16 = vmul.f32 %v5245_v2, %v2770_v28  ;;  %4855 = vmatprep.subr.bf16.mxu0 %v2783_v23 }
 0x408   :  { %4848 = vmatmul.mubr.msk.bf16.gmra.mrb[16].mxu0 %vm2440_vm3, %v5165_v22 }
 0x409   :  { %v2784_v40 = vpack.c.bf16 %v2780_v27, %v2779_v16  ;;  %4856 = vmatpush3.bf16.msra.mxu0 %v2783_v23  ;;  %v3028_v36 = vpop.permute.xlu0 %3027  ;;  %4859 = vmatprep.mubr.msk.bf16.mxu0 %vm2440_vm3, %v5166_v26  ;;  %v5176_v27 = vld [vmem:[%s6345_s6 + $0xb0] sm:$0xff]  }
 0x40a   :  { %v3026_v37 = vpop.permute.xlu1 %3025  ;;  %v3042_v54 = vmul.f32 %v5247_v53, %v3028_v36 }
 0x40b   :  { %4857 = vmatprep.subr.bf16.mxu0 %v2784_v40  ;;  %v3041_v55 = vmul.f32 %v5247_v53, %v3026_v37 }
 0x40d   :  { %4858 = vmatpush3.bf16.msra.mxu0 %v2784_v40  ;;  %v3032_v17 = vpop.permute.xlu0 %3031  ;;  %v3049_v57 = vpack.c.bf16 %v3042_v54, %v3041_v55 }
 0x40e   :  { %4867 = vmatprep.subr.bf16.mxu0 %v2907_v38  ;;  %v3030_v45 = vpop.permute.xlu1 %3029  ;;  %v3044_v58 = vmul.f32 %v5247_v53, %v3032_v17  ;;  %v5249_v17 = vld [vmem:[%s6342_s1 + $0x7] ss:$0 sm:$0xff] }
 0x40f   :  { %v3043_v60 = vmul.f32 %v5247_v53, %v3030_v45 }
 0x410   :  { %4860 = vmatmul.mubr.msk.bf16.vlgmr.msra.gmra.mrb[12].mxu0 %vm2440_vm3, %v5167_v39  ;;  %v5177_v39 = vld [vmem:[%s6345_s6 + $0xb8] sm:$0xff]  }
 0x411   :  { %4868 = vmatpush3.bf16.msra.mxu0 %v2907_v38  ;;  %v3036_v49 = vpop.permute.xlu0 %3035  ;;  %4863 = vmatprep.mubr.msk.bf16.mxu0 %vm2440_vm3, %v5168_v13  ;;  %v3050_v0 = vpack.c.bf16 %v3044_v58, %v3043_v60  ;;  %v5250_v60 = vld [vmem:[%s6342_s1 + $0x8] ss:$0 sm:$0xff] }
 0x412   :  { %4869 = vmatprep.subr.bf16.mxu0 %v2908_v46  ;;  %v3034_v35 = vpop.permute.xlu1 %3033  ;;  %v3046_v1 = vmul.f32 %v5247_v53, %v3036_v49 }
 0x413   :  { %v3045_v59 = vmul.f32 %v5247_v53, %v3034_v35 }
 0x415   :  { %4870 = vmatpush3.bf16.msra.mxu0 %v2908_v46  ;;  %v3040_v5 = vpop.permute.xlu0 %3039  ;;  %v3051_v4 = vpack.c.bf16 %v3046_v1, %v3045_v59 }
 0x416   :  { %4871 = vmatprep.subr.bf16.mxu0 %v2909_v24  ;;  %v3038_v34 = vpop.permute.xlu1 %3037  ;;  %v3048_v6 = vmul.f32 %v5247_v53, %v3040_v5 }
 0x417   :  { %v3047_v7 = vmul.f32 %v5247_v53, %v3038_v34 }
 0x418   :  { %4864 = vmatmul.mubr.msk.bf16.gmra.mrb[16].mxu0 %vm2440_vm3, %v5169_v50  ;;  %v5180_v50 = vld [vmem:[%s6345_s6 + $0xd0] sm:$0xff]  }
 0x419   :  { %4872 = vmatpush3.bf16.msra.mxu0 %v2909_v24  ;;  %v3170_v42 = vpop.permute.xlu0 %3169  ;;  %4875 = vmatprep.mubr.msk.bf16.mxu0 %vm2440_vm3, %v5170_v29  ;;  %v3052_v14 = vpack.c.bf16 %v3048_v6, %v3047_v7  ;;  %v5179_v24 = vld [vmem:[%s6345_s6 + $0xc8] sm:$0xff]  }
 0x41a   :  { %4873 = vmatprep.subr.bf16.mxu0 %v2910_v56  ;;  %v3168_v41 = vpop.permute.xlu1 %3167  ;;  %v3184_v18 = vmul.f32 %v5248_v15, %v3170_v42 }
 0x41b   :  { %v3183_v19 = vmul.f32 %v5248_v15, %v3168_v41 }
 0x41d   :  { %4874 = vmatpush3.bf16.msra.mxu0 %v2910_v56  ;;  %v3174_v61 = vpop.permute.xlu0 %3173  ;;  %v3191_v8 = vpack.c.bf16 %v3184_v18, %v3183_v19  ;;  %v5181_v56 = vld [vmem:[%s6345_s6 + $0xd8] sm:$0xff]   ;;  %v5186_v18 = vld [vmem:[%s6345_s6 + $0x100] sm:$0xff]  }
 0x41e   :  { %4883 = vmatprep.subr.bf16.mxu0 %v3049_v57  ;;  %v3172_v63 = vpop.permute.xlu1 %3171  ;;  %v3186_v22 = vmul.f32 %v5248_v15, %v3174_v61 }
 0x41f   :  { %v3185_v23 = vmul.f32 %v5248_v15, %v3172_v63 }
 0x420   :  { %4876 = vmatmul.mubr.msk.bf16.vlgmr.msra.gmra.mrb[12].mxu0 %vm2440_vm3, %v5171_v25 }
 0x421   :  { %4884 = vmatpush3.bf16.msra.mxu0 %v3049_v57  ;;  %v3178_v2 = vpop.permute.xlu0 %3177  ;;  %4879 = vmatprep.mubr.msk.bf16.mxu0 %vm2440_vm3, %v5172_v62  ;;  %v3192_v16 = vpack.c.bf16 %v3186_v22, %v3185_v23  ;;  %v5182_v57 = vld [vmem:[%s6345_s6 + $0xe0] sm:$0xff]   ;;  %v5260_v22 = vmov 0.0  }
 0x422   :  { %4885 = vmatprep.subr.bf16.mxu0 %v3050_v0  ;;  %v3176_v3 = vpop.permute.xlu1 %3175  ;;  %v3188_v31 = vmul.f32 %v5248_v15, %v3178_v2  ;;  %v5183_v2 = vld [vmem:[%s6345_s6 + $0xe8] sm:$0xff]   ;;  %4947 = vmatprep.subr.bf16.mxu1 %v5260_v22 }
 0x423   :  { %v3187_v32 = vmul.f32 %v5248_v15, %v3176_v3  ;;  %v5184_v3 = vld [vmem:[%s6345_s6 + $0xf0] sm:$0xff]   ;;  %4955 = vmatprep.mubr.msk.bf16.mxu1 %vm5261_vm4, %v5260_v22 }
 0x425   :  { %4886 = vmatpush3.bf16.msra.mxu0 %v3050_v0  ;;  %v3182_v11 = vpop.permute.xlu0 %3181  ;;  %v3193_v36 = vpack.c.bf16 %v3188_v31, %v3187_v32 }
 0x426   :  { %4887 = vmatprep.subr.bf16.mxu0 %v3051_v4  ;;  %v3180_v30 = vpop.permute.xlu1 %3179  ;;  %v3190_v37 = vmul.f32 %v5248_v15, %v3182_v11 }
 0x427   :  { %v3189_v38 = vmul.f32 %v5248_v15, %v3180_v30  ;;  %v5185_v15 = vld [vmem:[%s6345_s6 + $0xf8] sm:$0xff]  }
 0x428   :  { %4880 = vmatmul.mubr.msk.bf16.gmra.mrb[16].mxu0 %vm2440_vm3, %v5173_v9 }
 0x429   :  { %4888 = vmatpush3.bf16.msra.mxu0 %v3051_v4  ;;  %v3312_v20 = vpop.permute.xlu0 %3311  ;;  %4891 = vmatprep.mubr.msk.bf16.mxu0 %vm2440_vm3, %v5174_v12  ;;  %v3194_v44 = vpack.c.bf16 %v3190_v37, %v3189_v38 }
 0x42a   :  { %4889 = vmatprep.subr.bf16.mxu0 %v3052_v14  ;;  %v3310_v21 = vpop.permute.xlu1 %3309  ;;  %v3326_v13 = vmul.f32 %v5249_v17, %v3312_v20  ;;  %v5187_v20 = vld [vmem:[%s6345_s6 + $0x108] sm:$0xff]  }
 0x42b   :  { %v3325_v45 = vmul.f32 %v5249_v17, %v3310_v21  ;;  %v5188_v21 = vld [vmem:[%s6345_s6 + $0x110] sm:$0xff]  }
 0x42d   :  { %4890 = vmatpush3.bf16.msra.mxu0 %v3052_v14  ;;  %v3316_v26 = vpop.permute.xlu0 %3315  ;;  %v3333_v48 = vpack.c.bf16 %v3326_v13, %v3325_v45 }
 0x42e   :  { %4899 = vmatprep.subr.bf16.mxu0 %v3191_v8  ;;  %v3314_v28 = vpop.permute.xlu1 %3313  ;;  %v3328_v49 = vmul.f32 %v5249_v17, %v3316_v26 }
 0x42f   :  { %v3327_v35 = vmul.f32 %v5249_v17, %v3314_v28 }
 0x430   :  { %4892 = vmatmul.mubr.msk.bf16.vlgmr.msra.gmra.mrb[12].mxu0 %vm2440_vm3, %v5175_v10 }
 0x431   :  { %4900 = vmatpush3.bf16.msra.mxu0 %v3191_v8  ;;  %4895 = vmatprep.mubr.msk.bf16.mxu0 %vm2440_vm3, %v5176_v27  ;;  %v3320_v33 = vpop.permute.xlu0 %3319  ;;  %v3334_v5 = vpack.c.bf16 %v3328_v49, %v3327_v35  ;;  %v5189_v8 = vld [vmem:[%s6345_s6 + $0x118] sm:$0xff]  }
 0x432   :  { %4901 = vmatprep.subr.bf16.mxu0 %v3192_v16  ;;  %v3318_v40 = vpop.permute.xlu1 %3317  ;;  %v3330_v29 = vmul.f32 %v5249_v17, %v3320_v33 }
 0x433   :  { %v3329_v34 = vmul.f32 %v5249_v17, %v3318_v40 }
 0x435   :  { %4902 = vmatpush3.bf16.msra.mxu0 %v3192_v16  ;;  %v3324_v46 = vpop.permute.xlu0 %3323  ;;  %v3335_v53 = vpack.c.bf16 %v3330_v29, %v3329_v34 }
 0x436   :  { %4903 = vmatprep.subr.bf16.mxu0 %v3193_v36  ;;  %v3322_v47 = vpop.permute.xlu1 %3321  ;;  %v3332_v54 = vmul.f32 %v5249_v17, %v3324_v46 }
 0x437   :  { %v3331_v55 = vmul.f32 %v5249_v17, %v3322_v47 }
 0x438   :  { %4896 = vmatmul.mubr.msk.bf16.gmra.mrb[16].mxu0 %vm2440_vm3, %v5177_v39 }
 0x439   :  { %4904 = vmatpush3.bf16.msra.mxu0 %v3193_v36  ;;  %4907 = vmatprep.mubr.msk.bf16.mxu0 %vm2440_vm3, %v5178_v43  ;;  %v3454_v51 = vpop.permute.xlu0 %3453  ;;  %v3336_v58 = vpack.c.bf16 %v3332_v54, %v3331_v55 }
 0x43a   :  { %4905 = vmatprep.subr.bf16.mxu0 %v3194_v44  ;;  %v3452_v52 = vpop.permute.xlu1 %3451  ;;  %v3468_v25 = vmul.f32 %v5250_v60, %v3454_v51 }
 0x43b   :  { %v3467_v61 = vmul.f32 %v5250_v60, %v3452_v52 }
 0x43d   :  { %4906 = vmatpush3.bf16.msra.mxu0 %v3194_v44  ;;  %v3458_v42 = vpop.permute.xlu0 %3457  ;;  %v3475_v0 = vpack.c.bf16 %v3468_v25, %v3467_v61  ;;  %v5193_v25 = vld [vmem:[%s6349_s10 + $0x10] ss:$8 sps:$4 sm:$0xff]   ;;  %v5198_v61 = vld [vmem:[%s6349_s10 + $0x24] ss:$8 sps:$4 sm:$0xff]  }
 0x43e   :  { %4915 = vmatprep.subr.bf16.mxu0 %v3333_v48  ;;  %v3456_v41 = vpop.permute.xlu1 %3455  ;;  %v3470_v1 = vmul.f32 %v5250_v60, %v3458_v42 }
 0x43f   :  { %v3469_v59 = vmul.f32 %v5250_v60, %v3456_v41  ;;  %v3657_v41 = vld [vmem:[%s6348_s8] sm:$0x3] }
 0x440   :  { %4908 = vmatmul.mubr.msk.bf16.vlgmr.msra.gmra.mrb[12].mxu0 %vm2440_vm3, %v5179_v24 }
 0x441   :  { %4916 = vmatpush3.bf16.msra.mxu0 %v3333_v48  ;;  %4911 = vmatprep.mubr.msk.bf16.mxu0 %vm2440_vm3, %v5180_v50  ;;  %v3462_v62 = vpop.permute.xlu0 %3461  ;;  %v3476_v4 = vpack.c.bf16 %v3470_v1, %v3469_v59  ;;  %v5204_v1 = vld [vmem:[%s6349_s10 + $0x44] ss:$8 sps:$4 sm:$0xff]   ;;  %v5202_v59 = vld [vmem:[%s6349_s10 + $0x40] ss:$8 sps:$4 sm:$0xff]  }
 0x442   :  { %4917 = vmatprep.subr.bf16.mxu0 %v3334_v5  ;;  %v3460_v63 = vpop.permute.xlu1 %3459  ;;  %v3472_v6 = vmul.f32 %v5250_v60, %v3462_v62  ;;  %v5196_v62 = vld [vmem:[%s6349_s10 + $0x20] ss:$8 sps:$4 sm:$0xff]  }
 0x443   :  { %v3471_v7 = vmul.f32 %v5250_v60, %v3460_v63  ;;  %v5201_v63 = vld [vmem:[%s6349_s10 + $0x34] ss:$8 sps:$4 sm:$0xff]  }
 0x445   :  { %4918 = vmatpush3.bf16.msra.mxu0 %v3334_v5  ;;  %v3466_v9 = vpop.permute.xlu0 %3465  ;;  %v3477_v12 = vpack.c.bf16 %v3472_v6, %v3471_v7  ;;  %v5208_v6 = vld [vmem:[%s6349_s10 + $0x60] ss:$8 sps:$4 sm:$0xff]   ;;  %v5213_v7 = vld [vmem:[%s6349_s10 + $0x74] ss:$8 sps:$4 sm:$0xff]  }
 0x446   :  { %4919 = vmatprep.subr.bf16.mxu0 %v3335_v53  ;;  %v3464_v11 = vpop.permute.xlu1 %3463  ;;  %v3474_v30 = vmul.f32 %v5250_v60, %v3466_v9  ;;  %v5211_v9 = vld [vmem:[%s6349_s10 + $0x70] ss:$8 sps:$4 sm:$0xff]  }
 0x447   :  { %v3473_v14 = vmul.f32 %v5250_v60, %v3464_v11  ;;  %v5195_v60 = vld [vmem:[%s6349_s10 + $0x14] ss:$8 sps:$4 sm:$0xff]   ;;  %v5216_v11 = vld [vmem:[%s6349_s10 + $0x84] ss:$8 sps:$4 sm:$0xff]  }
 0x448   :  { %4912 = vmatmul.mubr.msk.bf16.gmra.mrb[16].mxu0 %vm2440_vm3, %v5181_v56 }
 0x449   :  { %4920 = vmatpush3.bf16.msra.mxu0 %v3335_v53  ;;  %4923 = vmatprep.mubr.msk.bf16.mxu0 %vm2440_vm3, %v5182_v57  ;;  %v3478_v19 = vpack.c.bf16 %v3474_v30, %v3473_v14  ;;  %v5190_v57 = vld [vmem:[%s6349_s10] ss:$8 sps:$4 sm:$0xff]   ;;  %v5219_v30 = vld [vmem:[%s6349_s10 + $0x94] ss:$8 sps:$4 sm:$0xff]   ;;  %v5217_v14 = vld [vmem:[%s6349_s10 + $0x90] ss:$8 sps:$4 sm:$0xff]  }
 0x44a   :  { %4921 = vmatprep.subr.bf16.mxu0 %v3336_v58 }
 0x44d   :  { %4922 = vmatpush3.bf16.msra.mxu0 %v3336_v58  ;;  %v5192_v58 = vld [vmem:[%s6349_s10 + $0x4] ss:$8 sps:$4 sm:$0xff]  }
 0x44e   :  { %4931 = vmatprep.subr.bf16.mxu0 %v3475_v0 }
 0x450   :  { %4924 = vmatmul.mubr.msk.bf16.vlgmr.msra.gmra.mrb[12].mxu0 %vm2440_vm3, %v5183_v2  ;;  %v5207_v2 = vld [vmem:[%s6349_s10 + $0x54] ss:$8 sps:$4 sm:$0xff]  }
 0x451   :  { %4932 = vmatpush3.bf16.msra.mxu0 %v3475_v0  ;;  %4927 = vmatprep.mubr.msk.bf16.mxu0 %vm2440_vm3, %v5184_v3  ;;  %v5199_v0 = vld [vmem:[%s6349_s10 + $0x30] ss:$8 sps:$4 sm:$0xff]  }
 0x452   :  { %4933 = vmatprep.subr.bf16.mxu0 %v3476_v4  ;;  %v5205_v3 = vld [vmem:[%s6349_s10 + $0x50] ss:$8 sps:$4 sm:$0xff]  }
 0x455   :  { %4934 = vmatpush3.bf16.msra.mxu0 %v3476_v4  ;;  %v5210_v4 = vld [vmem:[%s6349_s10 + $0x64] ss:$8 sps:$4 sm:$0xff]  }
 0x456   :  { %4935 = vmatprep.subr.bf16.mxu0 %v3477_v12  ;;  %v3609_v10 = vpop.permute.xlu0 %3608 }
 0x457   :  { %v3604_v23 = vpop.permute.xlu1 %3603 }
 0x458   :  { %4928 = vmatmul.mubr.msk.bf16.gmra.mrb[16].mxu0 %vm2440_vm3, %v5185_v15  ;;  %v5222_v15 = vld [vmem:[%s6349_s10 + $0xa4] ss:$8 sps:$4 sm:$0xff]  }
 0x459   :  { %4936 = vmatpush3.bf16.msra.mxu0 %v3477_v12  ;;  %4939 = vmatprep.mubr.msk.bf16.mxu0 %vm2440_vm3, %v5186_v18  ;;  %v5214_v12 = vld [vmem:[%s6349_s10 + $0x80] ss:$8 sps:$4 sm:$0xff]  }
 0x45a   :  { %4937 = vmatprep.subr.bf16.mxu0 %v3478_v19  ;;  %v3619_v27 = vpop.permute.xlu0 %3618  ;;  %v5220_v18 = vld [vmem:[%s6349_s10 + $0xa0] ss:$8 sps:$4 sm:$0xff]  }
 0x45b   :  { %v3614_v26 = vpop.permute.xlu1 %3613 }
 0x45d   :  { %4938 = vmatpush3.bf16.msra.mxu0 %v3478_v19  ;;  %v5225_v19 = vld [vmem:[%s6349_s10 + $0xb4] ss:$8 sps:$4 sm:$0xff]  }
 0x45e   :  { %v3629_v38 = vpop.permute.xlu0 %3628 }
 0x45f   :  { %v3624_v32 = vpop.permute.xlu1 %3623 }
 0x460   :  { %4940 = vmatmul.mubr.msk.bf16.vlgmr.msra.gmra.mrb[12].mxu0 %vm2440_vm3, %v5187_v20  ;;  %v5223_v20 = vld [vmem:[%s6349_s10 + $0xb0] ss:$8 sps:$4 sm:$0xff]  }
 0x461   :  { %4943 = vmatprep.mubr.msk.bf16.mxu0 %vm2440_vm3, %v5188_v21  ;;  %v5262_v21 = vmov 1983009808  }
 0x462   :  { %v3639_v24 = vpop.permute.xlu0 %3638 }
 0x463   :  { %v3634_v46 = vpop.permute.xlu1 %3633 }
 0x468   :  { %4944 = vmatmul.mubr.msk.bf16.gmra.mrb[16].mxu0 %vm2440_vm3, %v5189_v8  ;;  %v3716_v8 = vunpack.c.l.s4 %v5262_v21 }
 0x533   :  { %v4941_v28 = vpop.f32.mrb[12].mxu0 }
 0x534   :  { %v3643_v16 = vadd.f32 %v4941_v28, %v3614_v26  ;;  %v3554_v31 = vpop.f32.mrb[13].mxu0  ;;  %v5226_v26 = vld [vmem:[%s6349_s10 + $0xc0] ss:$8 sps:$4 sm:$0xff]  }
 0x535   :  { %v3641_v33 = vadd.f32 %v3604_v23, %v3554_v31  ;;  %v4942_v40 = vpop.f32.mrb[14].mxu0  ;;  %v3718_v23 = vlaneseq  ;;  %v3666_v31 = vpop.permute.xlu1 %3665 }
 0x536   :  { %v3644_v36 = vadd.f32 %v4942_v40, %v3619_v27  ;;  %v3557_v37 = vpop.f32.mrb[15].mxu0  ;;  %v3651_v43 = vmax.f32 %v3643_v16, 0.0  ;;  %v3717_v27 = vunpack.c.0.s8 %v3716_v8  ;;  %v5231_v16 = vld [vmem:[%s6349_s10 + $0xd4] ss:$8 sps:$4 sm:$0xff]  }
 0x537   :  { %v3642_v39 = vadd.f32 %v3609_v10, %v3557_v37  ;;  %v3649_v17 = vmax.f32 %v3641_v33, 0.0  ;;  %v5228_v10 = vld [vmem:[%s6349_s10 + $0xc4] ss:$8 sps:$4 sm:$0xff]   ;;  %v3719_v28 = vshrl.u32 %v3718_v23, 7  ;;  %v5229_v33 = vld [vmem:[%s6349_s10 + $0xd0] ss:$8 sps:$4 sm:$0xff]  }
 0x538   :  { %v3652_v44 = vmax.f32 %v3644_v36, 0.0 }
 0x539   :  { %v3650_v13 = vmax.f32 %v3642_v39, 0.0  ;;  %v3720_v36 = vsub.s32 %v3717_v27, %v3719_v28 }
 0x53a   :  { %v3659_v45 = vpack.c.bf16 %v3652_v44, %v3651_v43  ;;  %v5232_v43 = vld [vmem:[%s6349_s10 + $0xe0] ss:$8 sps:$4 sm:$0xff]  }
 0x53b   :  { %v3658_v47 = vpack.c.bf16 %v3650_v13, %v3649_v17  ;;  %v4945_v48 = vpop.f32.mrb[16].mxu0  ;;  %v5237_v13 = vld [vmem:[%s6349_s10 + $0xf4] ss:$8 sps:$4 sm:$0xff]  }
 0x53c   :  { %v3647_v49 = vadd.f32 %v4945_v48, %v3634_v46  ;;  %v3570_v35 = vpop.f32.mrb[17].mxu0  ;;  %v5235_v46 = vld [vmem:[%s6349_s10 + $0xf0] ss:$8 sps:$4 sm:$0xff]  }
 0x53d   :  { %v3645_v50 = vadd.f32 %v3624_v32, %v3570_v35  ;;  %v4946_v51 = vpop.f32.mrb[18].mxu0  ;;  %4948 = vmatpush3.bf16.msra.mxu1 %v3658_v47 }
 0x53e   :  { %v3648_v52 = vadd.f32 %v4946_v51, %v3639_v24  ;;  %v3573_v5 = vpop.f32.mrb[19].mxu0  ;;  %4949 = vmatprep.subr.bf16.mxu1 %v5260_v22  ;;  %v3655_v34 = vmax.f32 %v3647_v49, 0.0 }
 0x53f   :  { %v3646_v29 = vadd.f32 %v3629_v38, %v3573_v5  ;;  %v3653_v54 = vmax.f32 %v3645_v50, 0.0  ;;  %v5234_v38 = vld [vmem:[%s6349_s10 + $0xe4] ss:$8 sps:$4 sm:$0xff]  }
 0x540   :  { %v3656_v53 = vmax.f32 %v3648_v52, 0.0 }
 0x541   :  { %v3654_v55 = vmax.f32 %v3646_v29, 0.0  ;;  %4950 = vmatpush3.bf16.msra.mxu1 %v3659_v45 }
 0x542   :  { %v3661_v56 = vpack.c.bf16 %v3656_v53, %v3655_v34  ;;  %4951 = vmatprep.subr.bf16.mxu1 %v5260_v22 }
 0x543   :  { %v3660_v42 = vpack.c.bf16 %v3654_v55, %v3653_v54  ;;  %v3800_v55 = vsub.s32 0, %v3719_v28 }
 0x545   :  { %4952 = vmatpush3.bf16.msra.mxu1 %v3660_v42  ;;  %v3804_v42 = vsub.s32 1, %v3719_v28 }
 0x546   :  { %4953 = vmatprep.subr.bf16.mxu1 %v5260_v22 }
 0x549   :  { %4954 = vmatpush3.bf16.msra.mxu1 %v3661_v56  ;;  %v3796_v56 = vld [vmem:[%s6350_s11] sm:$0x3] }
 0x54a   :  { %3968 = vmatprep.subr.bf16.mxu1 %v5192_v58 }
 0x54c   :  { %4956 = vmatmul.mubr.msk.bf16.vlgmr.msra.gmra.mrb[8].mxu1 %vm2440_vm3, %v3657_v41  ;;  %v3801_v41 = vrot.slane %v3796_v56, %v3800_v55 }
 0x54d   :  { %3969 = vmatpush1.bf16.msra.mxu1 %v5190_v57  ;;  %v3805_v57 = vrot.slane %v3796_v56, %v3804_v42 }
 0x54e   :  { %3970 = vmatprep.subr.bf16.mxu1 %v5195_v60 }
 0x551   :  { %3971 = vmatpush1.bf16.msra.mxu1 %v5193_v25 }
 0x552   :  { %3972 = vmatprep.subr.bf16.mxu1 %v5198_v61 }
 0x555   :  { %3973 = vmatpush1.bf16.msra.mxu1 %v5196_v62 }
 0x556   :  { %3974 = vmatprep.subr.bf16.mxu1 %v5201_v63  ;;  %v4417_v63 = vld [vmem:[%s6351_s12] ss:$0 sm:$0xff] }
 0x559   :  { %3975 = vmatpush1.bf16.msra.mxu1 %v5199_v0 }
 0x55a   :  { %3976 = vmatprep.subr.bf16.mxu1 %v5204_v1 }
 0x55d   :  { %3977 = vmatpush1.bf16.msra.mxu1 %v5202_v59 }
 0x55e   :  { %3978 = vmatprep.subr.bf16.mxu1 %v5207_v2 }
 0x561   :  { %3979 = vmatpush1.bf16.msra.mxu1 %v5205_v3 }
 0x562   :  { %3980 = vmatprep.subr.bf16.mxu1 %v5210_v4  ;;  %v19_v4 = vstv %s6352_s13 }
 0x563   :  { %20 = vst [vmem:[#allocation3] sm:$0x1] %v19_v4 }
 0x565   :  { %3981 = vmatpush1.bf16.msra.mxu1 %v5208_v6 }
 0x566   :  { %3982 = vmatprep.subr.bf16.mxu1 %v5213_v7 }
 0x569   :  { %3983 = vmatpush1.bf16.msra.mxu1 %v5211_v9 }
 0x56a   :  { %3984 = vmatprep.subr.bf16.mxu1 %v5216_v11 }
 0x56d   :  { %3985 = vmatpush1.bf16.msra.mxu1 %v5214_v12 }
 0x56e   :  { %3986 = vmatprep.subr.bf16.mxu1 %v5219_v30  ;;  %v4418_v30 = vld [vmem:[#allocation3] ss:$0 sm:$0xff] }
 0x571   :  { %3987 = vmatpush1.bf16.msra.mxu1 %v5217_v14 }
 0x572   :  { %3988 = vmatprep.subr.bf16.mxu1 %v5222_v15 }
 0x575   :  { %3989 = vmatpush1.bf16.msra.mxu1 %v5220_v18 }
 0x576   :  { %3990 = vmatprep.subr.bf16.mxu1 %v5225_v19  ;;  %v4043_v19 = vand.u32 127, %v3718_v23 }
 0x578   :  { %vm4044_vm9 = vcmp.eq.s32.totalorder %v4043_v19, 16 }
 0x579   :  { %3991 = vmatpush1.bf16.msra.mxu1 %v5223_v20  ;;  %v4419_v20 = vsel %vm4044_vm9, 1.0, %v5260_v22 }
 0x57a   :  { %3992 = vmatprep.subr.bf16.mxu1 %v5228_v10 }
 0x57d   :  { %3993 = vmatpush1.bf16.msra.mxu1 %v5226_v26 }
 0x57e   :  { %3994 = vmatprep.subr.bf16.mxu1 %v5231_v16 }
 0x581   :  { %3995 = vmatpush1.bf16.msra.mxu1 %v5229_v33 }
 0x582   :  { %3996 = vmatprep.subr.bf16.mxu1 %v5234_v38 }
 0x585   :  { %3997 = vmatpush1.bf16.msra.mxu1 %v5232_v43 }
 0x586   :  { %3998 = vmatprep.subr.bf16.mxu1 %v5237_v13 }
 0x589   :  { %3999 = vmatpush1.bf16.msra.mxu1 %v5235_v46 }
 0x61f   :  { %v3705_v32 = vpop.f32.mrb[8].mxu1 }
 0x620   :  { %v3706_v40 = vadd.f32 %v3705_v32, %v3666_v31  ;;  %v4957_v37 = vpop.f32.mrb[9].mxu1 }
 0x621   :  { %v3708_v39 = vpop.f32.mrb[10].mxu1 }
 0x622   :  { %v3711_v44 = vmax.f32 %v3706_v40, 0.0  ;;  %v4958_v17 = vpop.f32.mrb[11].mxu1 }
 0x624   :  { %3713 = vst.msk [vmem:[#allocation2] sm:$0x1] %vm3712_vm5, %v3711_v44  ;;  %v3721_v45 = vrot.slane %v3711_v44, %v3720_v36 }
 0x626   :  { %v3722_v47 = vrot.slane %v3721_v45, 7  ;;  %3738 = vrot.lane.b32.xlu0 %v3721_v45, %s5263_s21  ;;  %v3729_v48 = vcombine.high %v3721_v45, %v3721_v45 }
 0x628   :  { %3744 = vrot.lane.b32.xlu1 %v3729_v48, %s5263_s21  ;;  %3731 = vst.msk [vmem:[#allocation2 + $0x2] sm:$0x1] %vm3712_vm5, %v3729_v48  ;;  %v3723_v49 = vrot.slane %v3722_v47, 2  ;;  %v3732_v35 = vrot.slane %v3729_v48, 7 }
 0x62a   :  { %3724 = vrot.lane.b32.xlu0 %v3723_v49, %s5263_s21  ;;  %v3733_v24 = vrot.slane %v3732_v35, 2 }
 0x62c   :  { %3734 = vrot.lane.b32.xlu1 %v3733_v24, %s5263_s21 }
 0x698   :  { %v3739_v50 = vpop.permute.xlu0 %3738 }
 0x699   :  { %3741 = vst.msk [vmem:[#allocation2 + $0x1] sm:$0x1] %vm3712_vm5, %v3739_v50 }
 0x69a   :  { %3743 = vst.msk [vmem:[#allocation2 + $0x1] sm:$0x1] %vm3727_vm6, %v3723_v49  ;;  %v3745_v51 = vpop.permute.xlu1 %3744 }
 0x69b   :  { %3747 = vst.msk [vmem:[#allocation2 + $0x3] sm:$0x1] %vm3712_vm5, %v3745_v51 }
 0x69c   :  { %3749 = vst.msk [vmem:[#allocation2 + $0x3] sm:$0x1] %vm3727_vm6, %v3733_v24  ;;  %v3725_v52 = vpop.permute.xlu0 %3724 }
 0x69d   :  { %3728 = vst.msk [vmem:[#allocation2] sm:$0x1] %vm3727_vm6, %v3725_v52 }
 0x69e   :  { %v3735_v5 = vpop.permute.xlu1 %3734 }
 0x69f   :  { %3737 = vst.msk [vmem:[#allocation2 + $0x2] sm:$0x1] %vm3727_vm6, %v3735_v5 }
 0x6a6   :  { %v4384_v29 = vld.sshfl [vmem:[#allocation2] sm:$0x33 pattern:$0x76325410] }
 0x6a7   :  { %v3759_v34 = vcombine.high %v4384_v29, %v4384_v29  ;;  %v3762_v54 = vpack.c.bf16 %v4384_v29, %v4384_v29 }
 0x6a9   :  { %v3763_v53 = vpack.c.bf16 %v3759_v34, %v3759_v34 }
 0x6ab   :  { %4000 = vmatprep.mubr.bf16.mxu1 %v3763_v53 }
 0x6ac   :  { %4001 = vmatmul.mubr.bf16.vlgmr.msra.gmra.mrb[12].mxu1 %v3762_v54 }
 0x77f   :  { %v4002_v58 = vpop.f32.mrb[12].mxu1 }
 0x780   :  { %v4003_v60 = vadd.f32 %v4002_v58, %v3801_v41  ;;  %v4004_v25 = vpop.f32.mrb[13].mxu1 }
 0x781   :  { %v4005_v61 = vadd.f32 %v4004_v25, %v3805_v57  ;;  %v4006_v62 = vpop.f32.mrb[14].mxu1 }
 0x782   :  { %v4007_v0 = vpop.f32.mrb[15].mxu1  ;;  %v4010_v1 = vsel %vm4009_vm7, %v4003_v60, -inf }
 0x783   :  { %v4021_v59 = vmax.f32 %v4005_v61, 0.0  ;;  %4011 = vmax.xlane.f32.xlu0 %v4010_v1 }
 0x785   :  { %v4029_v2 = vmul.f32 %v4417_v63, %v4021_v59 }
 0x787   :  { %v4031_v3 = vsel %vm4030_vm8, %v4029_v2, 0.0 }
 0x788   :  { %4032 = vadd.xlane.f32.xlu1 %v4031_v3 }
 0x810   :  { %v4012_v6 = vpop.xlane.xlu0 %4011 }
 0x811   :  { %v4013_v7 = vsub.f32 %v4003_v60, %v4012_v6 }
 0x813   :  { %v4014_v9 = vmul.f32 1.442695, %v4013_v7 }
 0x815   :  { %5238 = vpow2.f32 %v4014_v9  ;;  %v4033_v14 = vpop.xlane.xlu1 %4032 }
 0x816   :  { %v4041_v15 = vadd.f32 %v4418_v30, %v4033_v14 }
 0x81f   :  { %v5239_v11 = vpop.eup %5238 }
 0x820   :  { %v4016_v12 = vsel %vm4009_vm7, %v5239_v11, 0.0 }
 0x821   :  { %4017 = vadd.xlane.f32.xlu0 %v4016_v12 }
 0x837   :  { %4049 = vperm.xlu0 %5152, %v4041_v15  }
 0x8ae   :  { %v4018_v18 = vpop.xlane.xlu0 %4017 }
 0x8af   :  { %5240 = vrcp.f32 %v4018_v18 }
 0x8b6   :  { %v4050_v21 = vpop.permute.xlu0 %4049 }
 0x8b7   :  { %v4052_v26 = vmul.f32 %v4419_v20, %v4050_v21 }
 0x8b9   :  { %v5241_v8 = vpop.eup %5240 }
 0x8ba   :  { %v4020_v10 = vmul.f32 %v5241_v8, %v5239_v11 }
 0x8bc   :  { %v4053_v27 = vadd.f32 %v4052_v26, %v4020_v10 }
 0x8be   :  { %4054 = vst [vmem:[%s6353_s14] sm:$0x3] %v4053_v27 }

</bundles_post_ra>
